<compile_context>
chip_gen: v7x
topology: tpu7x:2x2x1
jax: 0.10.0
libtpu: 0.0.40
codegen_flags: <defaults>
</compile_context>

<pallas_src>
import functools

import jax
import jax.numpy as jnp
from jax.experimental import pallas as pl
from jax.experimental.pallas import tpu as pltpu


def _round_up(x, m):
    return ((x + m - 1) // m) * m


def _mlp_kernel(x_ref, w1_ref, b1_ref, w2_ref, b2_ref, w3_ref, b3_ref, o_ref):
    # Layer 1: (TM, Din) @ (Din, H) on the MXU, f32 accumulation, fused bias + ReLU.
    h = jnp.dot(x_ref[...], w1_ref[...], preferred_element_type=jnp.float32)
    h = jnp.maximum(h + b1_ref[...], 0.0)
    # TODO(synk): training-mode dropout (pltpu.prng_seed / prng_random_bits) not implemented;
    # forward here matches model.eval() semantics (dropout == identity).
    # Layer 2: (TM, H) @ (H, H) on the MXU, fused bias + ReLU.
    h = jnp.dot(h, w2_ref[...], preferred_element_type=jnp.float32)
    h = jnp.maximum(h + b2_ref[...], 0.0)
    # Layer 3 (out_features == 1): contract the native-layout (1, H) weight against the
    # (TM, H) hidden tile over H -> lane-dense (1, TM) row, so the output store is a
    # full-width vst rather than 1-lane masked stores.
    # (Per review: Mosaic's transposed-RHS MXU mode handles the lane-dim contraction;
    # if lowering ever materializes an h transpose, switch to dot(h, w3.T) + tiny relayout.)
    out_row = jax.lax.dot_general(
        w3_ref[...], h,
        dimension_numbers=(((1,), (1,)), ((), ())),
        preferred_element_type=jnp.float32,
    )
    o_ref[...] = (out_row + b3_ref[0]).astype(o_ref.dtype)


def prepare_params(w1, b1, w2, b2, w3, b3):
    """One-time weight prep (hoisted out of the per-call path).

    PyTorch nn.Linear layouts in: w1 (H, Din), w2 (H, H), w3 (1, H), biases (H,)/(1,).
    """
    H = w1.shape[0]
    return {
        "w1_t": jnp.asarray(w1, jnp.float32).T,          # (Din, H)
        "b1": jnp.asarray(b1, jnp.float32).reshape(1, H),
        "w2_t": jnp.asarray(w2, jnp.float32).T,          # (H, H)
        "b2": jnp.asarray(b2, jnp.float32).reshape(1, H),
        "w3": jnp.asarray(w3, jnp.float32),              # (1, H) native, lane-dense
        "b3": jnp.asarray(b3, jnp.float32).reshape(1),   # scalar -> SMEM
    }


@functools.partial(jax.jit, static_argnames=("block_m",))
def regression_nn_forward(x, params, *, block_m=2048):
    """Forward pass of RegressionNN (inference; dropout disabled).

    x: (B, Din); params from prepare_params(). Returns (B, 1) float32.
    """
    B, Din = x.shape
    H = params["w1_t"].shape[1]

    # Resident-weight strategy: W1^T + W2^T live whole in VMEM across all grid steps.
    # Guard the v7x 64 MiB VMEM ceiling (first generation to hit it as H grows).
    # TODO(synk): add a K-tiled W2 fallback (grid over H + f32 accumulator) for large H.
    assert (Din * H + H * H) * 4 <= 16 * 1024 * 1024, "H too large for resident weights"

    # Batch tile: aim for 2 tiles (keeps both v7x TCs busy; only 1-2 serial steps on
    # single-TC v5e/v6e). Multiple of 128 so the (1, tm) output block is lane-dense.
    tm = min(_round_up(pl.cdiv(B, 2), 128), _round_up(block_m, 128))
    num_tiles = pl.cdiv(B, tm)

    x_f = x.astype(jnp.float32)

    out = pl.pallas_call(
        _mlp_kernel,
        out_shape=jax.ShapeDtypeStruct((1, B), jnp.float32),
        grid_spec=pltpu.PrefetchScalarGridSpec(
            num_scalar_prefetch=0,
            grid=(num_tiles,),
            in_specs=[
                pl.BlockSpec((tm, Din), lambda i: (i, 0)),   # x tile (pipelined; last tile ragged)
                pl.BlockSpec((Din, H), lambda i: (0, 0)),    # W1^T (resident)
                pl.BlockSpec((1, H), lambda i: (0, 0)),      # b1
                pl.BlockSpec((H, H), lambda i: (0, 0)),      # W2^T (resident)
                pl.BlockSpec((1, H), lambda i: (0, 0)),      # b2
                pl.BlockSpec((1, H), lambda i: (0, 0)),      # W3 (native layout)
                pl.BlockSpec(memory_space=pltpu.MemorySpace.SMEM),  # b3 scalar
            ],
            out_specs=pl.BlockSpec((1, tm), lambda i: (0, i)),  # lane-dense output row
        ),
        compiler_params=pltpu.CompilerParams(
            dimension_semantics=("parallel",),   # batch tiles independent -> megacore on v7x
            vmem_limit_bytes=32 * 1024 * 1024,   # safe on v5e/v6e/v7x; tiles are <1 MiB here
        ),
    )(x_f, params["w1_t"], params["b1"], params["w2_t"], params["b2"],
      params["w3"], params["b3"])

    # (1, B) lane-dense slab -> (B, 1); fused under jit, no padded rows to slice off.
    return out.reshape(B, 1)


if __name__ == "__main__":
    key = jax.random.PRNGKey(0)
    kx, k1, k2, k3 = jax.random.split(key, 4)

    batch, input_dim, hidden_dim = 2000, 32, 64
    x = jax.random.normal(kx, (batch, input_dim), dtype=jnp.float32)

    # Xavier-normal weights, zero biases — matches RegressionNN._init_weights.
    def xavier_normal(k, shape):
        fan_out, fan_in = shape
        std = (2.0 / (fan_in + fan_out)) ** 0.5
        return std * jax.random.normal(k, shape, dtype=jnp.float32)

    w1 = xavier_normal(k1, (hidden_dim, input_dim))
    b1 = jnp.zeros((hidden_dim,), jnp.float32)
    w2 = xavier_normal(k2, (hidden_dim, hidden_dim))
    b2 = jnp.zeros((hidden_dim,), jnp.float32)
    w3 = xavier_normal(k3, (1, hidden_dim))
    b3 = jnp.zeros((1,), jnp.float32)

    # Hoisted one-time weight prep, then the jitted forward.
    params = prepare_params(w1, b1, w2, b2, w3, b3)
    jax.block_until_ready(params)

    # B=2000, tm=1024 -> 2 grid tiles, second one ragged (exercises the no-pad path).
    out = regression_nn_forward(x, params)
    jax.block_until_ready(out)

    # Pure-JAX reference (eval mode: dropout is identity).
    h = jnp.maximum(x @ w1.T + b1, 0.0)
    h = jnp.maximum(h @ w2.T + b2, 0.0)
    ref = h @ w3.T + b3

    assert out.shape == (batch, 1)
    assert jnp.allclose(out, ref, atol=1e-4, rtol=1e-4)
    print("KERNEL_OK")
</pallas_src>

<mosaic_0001>
module attributes {stable_mosaic.version = 11 : i64} {
  func.func @_mlp_kernel(%arg0: i32, %arg1: memref<1024x32xf32, #tpu.memory_space<vmem>>, %arg2: memref<32x64xf32, #tpu.memory_space<vmem>>, %arg3: memref<1x64xf32, #tpu.memory_space<vmem>>, %arg4: memref<64x64xf32, #tpu.memory_space<vmem>>, %arg5: memref<1x64xf32, #tpu.memory_space<vmem>>, %arg6: memref<1x64xf32, #tpu.memory_space<vmem>>, %arg7: memref<1xf32, #tpu.memory_space<smem>>, %arg8: memref<1x1024xf32, #tpu.memory_space<vmem>>) attributes {dimension_semantics = [#tpu.dimension_semantics<parallel>], iteration_bounds = array<i64: 2>, scalar_prefetch = 0 : i64, scratch_operands = 0 : i64, tpu.core_type = #tpu.core_type<tc>, window_params = [{transform_indices = @transform_0, window_bounds = array<i64: 1024, 32>}, {pipeline_mode = #tpu.pipeline_mode<synchronous>, transform_indices = @transform_1, window_bounds = array<i64: 32, 64>}, {pipeline_mode = #tpu.pipeline_mode<synchronous>, transform_indices = @transform_2, window_bounds = array<i64: 1, 64>}, {pipeline_mode = #tpu.pipeline_mode<synchronous>, transform_indices = @transform_3, window_bounds = array<i64: 64, 64>}, {pipeline_mode = #tpu.pipeline_mode<synchronous>, transform_indices = @transform_4, window_bounds = array<i64: 1, 64>}, {pipeline_mode = #tpu.pipeline_mode<synchronous>, transform_indices = @transform_5, window_bounds = array<i64: 1, 64>}, {transform_indices = @transform_6, window_bounds = array<i64: 1>}, {transform_indices = @transform_7, window_bounds = array<i64: 1, 1024>}]} {
    %c0 = arith.constant 0 : index
    %c0_0 = arith.constant 0 : index
    %0 = vector.load %arg1[%c0, %c0_0] : memref<1024x32xf32, #tpu.memory_space<vmem>>, vector<1024x32xf32>
    %c0_1 = arith.constant 0 : index
    %c0_2 = arith.constant 0 : index
    %1 = vector.load %arg2[%c0_1, %c0_2] : memref<32x64xf32, #tpu.memory_space<vmem>>, vector<32x64xf32>
    %cst = arith.constant dense<0.000000e+00> : vector<1024x64xf32>
    %2 = tpu.matmul %0, %1, %cst {dimension_numbers = #tpu.dot_dimension_numbers<[1], [0], [0], [1], [0, 0, 1, 1], [], []>} : vector<1024x32xf32>, vector<32x64xf32>, vector<1024x64xf32> -> vector<1024x64xf32>
    %c0_3 = arith.constant 0 : index
    %c0_4 = arith.constant 0 : index
    %3 = vector.load %arg3[%c0_3, %c0_4] : memref<1x64xf32, #tpu.memory_space<vmem>>, vector<1x64xf32>
    %4 = vector.broadcast %3 : vector<1x64xf32> to vector<1024x64xf32>
    %5 = arith.addf %2, %4 : vector<1024x64xf32>
    %cst_5 = arith.constant 0.000000e+00 : f32
    %6 = vector.broadcast %cst_5 : f32 to vector<1024x64xf32>
    %7 = arith.maximumf %5, %6 : vector<1024x64xf32>
    %c0_6 = arith.constant 0 : index
    %c0_7 = arith.constant 0 : index
    %8 = vector.load %arg4[%c0_6, %c0_7] : memref<64x64xf32, #tpu.memory_space<vmem>>, vector<64x64xf32>
    %cst_8 = arith.constant dense<0.000000e+00> : vector<1024x64xf32>
    %9 = tpu.matmul %7, %8, %cst_8 {dimension_numbers = #tpu.dot_dimension_numbers<[1], [0], [0], [1], [0, 0, 1, 1], [], []>} : vector<1024x64xf32>, vector<64x64xf32>, vector<1024x64xf32> -> vector<1024x64xf32>
    %c0_9 = arith.constant 0 : index
    %c0_10 = arith.constant 0 : index
    %10 = vector.load %arg5[%c0_9, %c0_10] : memref<1x64xf32, #tpu.memory_space<vmem>>, vector<1x64xf32>
    %11 = vector.broadcast %10 : vector<1x64xf32> to vector<1024x64xf32>
    %12 = arith.addf %9, %11 : vector<1024x64xf32>
    %cst_11 = arith.constant 0.000000e+00 : f32
    %13 = vector.broadcast %cst_11 : f32 to vector<1024x64xf32>
    %14 = arith.maximumf %12, %13 : vector<1024x64xf32>
    %c0_12 = arith.constant 0 : index
    %c0_13 = arith.constant 0 : index
    %15 = vector.load %arg6[%c0_12, %c0_13] : memref<1x64xf32, #tpu.memory_space<vmem>>, vector<1x64xf32>
    %cst_14 = arith.constant dense<0.000000e+00> : vector<1x1024xf32>
    %16 = tpu.matmul %15, %14, %cst_14 {dimension_numbers = #tpu.dot_dimension_numbers<[1], [1], [0], [0], [0, 0, 1, 0], [], []>} : vector<1x64xf32>, vector<1024x64xf32>, vector<1x1024xf32> -> vector<1x1024xf32>
    %c0_15 = arith.constant 0 : index
    %17 = memref.load %arg7[%c0_15] : memref<1xf32, #tpu.memory_space<smem>>
    %18 = vector.broadcast %17 : f32 to vector<1x1024xf32>
    %19 = arith.addf %16, %18 : vector<1x1024xf32>
    %c0_16 = arith.constant 0 : index
    %c0_17 = arith.constant 0 : index
    %20 = vector.load %arg8[%c0_16, %c0_17] : memref<1x1024xf32, #tpu.memory_space<vmem>>, vector<1x1024xf32>
    tpu.vector_store %arg8[%c0_16, %c0_17], %19 {strides = array<i32>} : memref<1x1024xf32, #tpu.memory_space<vmem>>, vector<1x1024xf32>,
    return
  }
  func.func @transform_0(%arg0: i32) -> (i32, i32) {
    %c0_i32 = arith.constant 0 : i32
    %c0_i32_0 = arith.constant 0 : i32
    return %arg0, %c0_i32 : i32, i32
  }
  func.func @transform_1(%arg0: i32) -> (i32, i32) {
    %c0_i32 = arith.constant 0 : i32
    %c0_i32_0 = arith.constant 0 : i32
    %c0_i32_1 = arith.constant 0 : i32
    return %c0_i32, %c0_i32_0 : i32, i32
  }
  func.func @transform_2(%arg0: i32) -> (i32, i32) {
    %c0_i32 = arith.constant 0 : i32
    %c0_i32_0 = arith.constant 0 : i32
    %c0_i32_1 = arith.constant 0 : i32
    return %c0_i32, %c0_i32_0 : i32, i32
  }
  func.func @transform_3(%arg0: i32) -> (i32, i32) {
    %c0_i32 = arith.constant 0 : i32
    %c0_i32_0 = arith.constant 0 : i32
    %c0_i32_1 = arith.constant 0 : i32
    return %c0_i32, %c0_i32_0 : i32, i32
  }
  func.func @transform_4(%arg0: i32) -> (i32, i32) {
    %c0_i32 = arith.constant 0 : i32
    %c0_i32_0 = arith.constant 0 : i32
    %c0_i32_1 = arith.constant 0 : i32
    return %c0_i32, %c0_i32_0 : i32, i32
  }
  func.func @transform_5(%arg0: i32) -> (i32, i32) {
    %c0_i32 = arith.constant 0 : i32
    %c0_i32_0 = arith.constant 0 : i32
    %c0_i32_1 = arith.constant 0 : i32
    return %c0_i32, %c0_i32_0 : i32, i32
  }
  func.func @transform_6(%arg0: i32) -> i32 {
    %c0_i32 = arith.constant 0 : i32
    %c0_i32_0 = arith.constant 0 : i32
    return %c0_i32 : i32
  }
  func.func @transform_7(%arg0: i32) -> (i32, i32) {
    %c0_i32 = arith.constant 0 : i32
    %c0_i32_0 = arith.constant 0 : i32
    return %c0_i32, %arg0 : i32, i32
  }
}

</mosaic_0001>

<bundles_post_ra>
// kernel: regression_nn_forward.1
= control target key start
LH: loop header
LB: loop body
LE: loop exit
PB: predicated region body
PF: predicated region fallthrough
CT: control target
= control target key end

     0   :  { %s6328_s0 = inlined_call_operand.vmem [shape: f32[2000,32], index: 0, kind: input, shape index: {}]   ;;  %s6329_s1 = inlined_call_operand.vmem [shape: f32[32,64], index: 1, kind: input, shape index: {}]   ;;  %s6330_s2 = inlined_call_operand.vmem [shape: f32[1,64], index: 2, kind: input, shape index: {}]   ;;  %s6331_s3 = inlined_call_operand.vmem [shape: f32[64,64], index: 3, kind: input, shape index: {}]   ;;  %s6332_s4 = inlined_call_operand.vmem [shape: f32[1,64], index: 4, kind: input, shape index: {}]   ;;  %s6333_s5 = inlined_call_operand.vmem [shape: f32[1,64], index: 5, kind: input, shape index: {}]   ;;  %s6334_s6 = inlined_call_operand.<no memory space> [shape: f32[1], index: 6, kind: input, shape index: {}]   ;;  %s6335_s7 = inlined_call_operand.hbm [shape: f32[1,2000], index: 7, kind: output, shape index: {}]  }
   0x1   :  { %12 = sst [smem:[#allocation2]] %s6334_s6 }
   0x2   :  { %13 = vsyncpa [#allocation4], 0 }
   0x3   :  { %15 = vsyncpa [#allocation4 + $0x1], 0  ;;  %s5280_s26 = smov 0   ;;  %s5282_s27 = smov 0  }
   0x4   :  { %s5284_s28 = smov 0   ;;  %s5286_s29 = smov 0  }
   0x5 LB: > { %s3697_s6 = sadd.s32 4294967295, %s5233_s29   ;;  %s3698_s30 = sadd.s32 4294967294, %s5233_s29   ;;  %s5233_s29 = sphi %s5286_s29, %s6343_s29   ;;  %s5229_s28 = sphi %s5284_s28, %s6342_s28   ;;  %s5225_s27 = sphi %s5282_s27, %s6341_s27   ;;  %s5221_s26 = sphi %s5280_s26, %s6340_s26  }
   0x6   : > { %s5303_s8 = sadd.s32 1, %s5233_s29   ;;  %s180_s9 = sadd.s32 1, %s5229_s28 }
   0x7   : > { %s177_s10 = ssub.s32 %s5233_s29, %s5303_s8  ;;  %p190_p0 = scmp.ne.s32.totalorder %s5229_s28, %s5225_s27 }
   0x8   : > { %p178_p1 = scmp.eq.s32.totalorder %s177_s10, 0  ;;  %p191_p2 = scmp.eq.s32.totalorder %s3697_s6, 1 }
   0x9   : > { %p196_p3 = scmp.ne.s32.totalorder %s5225_s27, %s5221_s26  ;;  %p197_p4 = scmp.eq.s32.totalorder %s3698_s30, 1 }
   0xa   : > { %s5313_s11 = scalar_select %p178_p1, %s5229_s28, %s180_s9  }
   0xb   : > { %p5315_p5 = por %p191_p2, %p190_p0  ;;  %p5319_p6 = por %p197_p4, %p196_p3 }
   0xc   : > { %p3701_p7 = scmp.ge.s32.totalorder %s5233_s29, 1  ;;  %p250_p8 = scmp.lt.s32.totalorder %s5233_s29, 3 }
   0xe   : > { %p251_p9 = pnand %p3701_p7, %p250_p8 }
   0xf   : > { %v429_v0 = vld [vmem:[%s6329_s1] sm:$0xff] (!%p251_p9)  ;;  %v430_v1 = vld [vmem:[%s6329_s1 + $0x8] sm:$0xff] (!%p251_p9)  ;;  %v431_v2 = vld [vmem:[%s6329_s1 + $0x10] sm:$0xff] (!%p251_p9)  ;;  %s5334_s20 = sshll.u32 (!%p251_p9), %s3697_s6, 7  ;;  %vm440_vm0 = vcmask (!%p251_p9), 261120   ;;  %vm1673_vm1 = vcmask (!%p251_p9), 523264  }
  0x10   : > { %254 = sbr.rel (%p251_p9) target bundleno = 993 (0x3e1), region = 48  ;;  %v4913_v3 = vpack.c.bf16 (!%p251_p9), %v430_v1, %v429_v0  ;;  %v432_v4 = vld [vmem:[%s6329_s1 + $0x18] sm:$0xff] (!%p251_p9)  ;;  %p291_p10 = scmp.lt.s32.totalorder (!%p251_p9), %s5334_s20, 249  ;;  %v1658_v19 = vld [vmem:[%s6331_s3] sm:$0xff] (!%p251_p9)  ;;  %v1659_v20 = vld [vmem:[%s6331_s3 + $0x8] sm:$0xff] (!%p251_p9) }
  0x11   : > { %v4917_v5 = vpack.c.bf16 (!%p251_p9), %v432_v4, %v431_v2  ;;  %v4921_v21 = vpack.c.bf16 (!%p251_p9), %v1659_v20, %v1658_v19  ;;  %v1660_v22 = vld [vmem:[%s6331_s3 + $0x10] sm:$0xff] (!%p251_p9)  ;;  %v1661_v24 = vld [vmem:[%s6331_s3 + $0x18] sm:$0xff] (!%p251_p9)  ;;  %v1662_v27 = vld [vmem:[%s6331_s3 + $0x20] sm:$0xff] (!%p251_p9)  ;;  %s283_s25 = sand.u32 (!%p251_p9), 1, %s5225_s27   ;;  %s5236_s18 = smov (!%p251_p9), [#allocation3]  }
  0x12   : > { %4914 = vmatprep.subr.bf16.mxu0 (!%p251_p9), %v4913_v3  ;;  %v4925_v26 = vpack.c.bf16 (!%p251_p9), %v1661_v24, %v1660_v22  ;;  %v1663_v28 = vld [vmem:[%s6331_s3 + $0x28] sm:$0xff] (!%p251_p9)  ;;  %v1664_v60 = vld [vmem:[%s6331_s3 + $0x30] sm:$0xff] (!%p251_p9)  ;;  %v1665_v61 = vld [vmem:[%s6331_s3 + $0x38] sm:$0xff] (!%p251_p9)  ;;  %s3702_s30 = sshll.u32 (!%p251_p9), %s283_s25, 3  ;;  %s3625_s16 = scalar_lea.sflag (!%p251_p9), [#allocation4], %s283_s25 }
  0x13   : > { %4916 = vmatpush3.bf16.msra.mxu0 (!%p251_p9), %v4913_v3  ;;  %4922 = vmatprep.subr.bf16.mxu1 (!%p251_p9), %v4921_v21  ;;  %v4929_v29 = vpack.c.bf16 (!%p251_p9), %v1663_v28, %v1662_v27  ;;  %v4933_v62 = vpack.c.bf16 (!%p251_p9), %v1665_v61, %v1664_v60  ;;  %v5586_v61 = vld [vmem:[%s6330_s2] ss:$0 sm:$0xff] (!%p251_p9)  ;;  %vm5931_vm2 = vmpackc.low (!%p251_p9), %vm1673_vm1, %vm1673_vm1  ;;  %s285_s9 = scalar_lea.vmem (!%p251_p9), [#allocation3], %s3702_s30  ;;  %s5175_s19 = sshll.u32 (!%p251_p9), %s5236_s18, 4  ;;  %s5176_s19 = int_to_ptr.vmem [resolvable:$false] %s5175_s19 }
  0x14   : > { %4918 = vmatprep.subr.bf16.mxu0 (!%p251_p9), %v4917_v5  ;;  %4924 = vmatpush3.bf16.msra.mxu1 (!%p251_p9), %v4921_v21  ;;  %s3639_s10 = sshll.u32 (!%p251_p9), %s285_s9, 4  ;;  %s5177_s21 = scalar_lea.vmem (!%p251_p9), %s5176_s19, 256  ;;  %s6288_s10 = int_to_ptr.vmem [resolvable:$true] %s3639_s10 }
  0x15   : > { %4926 = vmatprep.subr.bf16.mxu1 (!%p251_p9), %v4925_v26  ;;  %s5171_s17 = scalar_lea.vmem (!%p251_p9), %s6288_s10, 128  ;;  %p5178_p0 = scmp.lt.s32.totalorder (!%p251_p9), %s6288_s10, %s5176_s19 }
  0x16   : > { %p5172_p11 = scmp.ne.s32.totalorder (!%p251_p9), %s6288_s10, %s5171_s17  ;;  %p5179_p1 = scmp.lt.s32.totalorder (!%p251_p9), %s5177_s21, %s5171_s17 }
  0x17   : > { %s292_s23 = scalar_select %p291_p10, %s5334_s20, 249  ;;  %4920 = vmatpush3.bf16.msra.mxu0 %v4917_v5 }
  0x18   : > { %4928 = vmatpush3.bf16.msra.mxu1 %v4925_v26  ;;  %p5173_p12 = pnand %p5172_p11, %p5315_p5  ;;  %p5180_p2 = por %p5179_p1, %p5178_p0 }
  0x19   : > { %s3704_s24 = sshll.u32 %s292_s23, 3  ;;  %4930 = vmatprep.subr.bf16.mxu1 %v4929_v29 }
  0x1a   : > { %s5344_s6 = scalar_lea.vmem %s6328_s0, %s3704_s24  ;;  %s2892_s24 = sld [smem:[#allocation2]] }
  0x1b   : > { %v301_v6 = vld [vmem:[%s5344_s6] sm:$0xff]  ;;  %v302_v7 = vld [vmem:[%s5344_s6 + $0x8] sm:$0xff]  ;;  %v303_v8 = vld [vmem:[%s5344_s6 + $0x10] sm:$0xff]  ;;  %p5174_p13 = pneg %p5173_p12 }
  0x1c   : > { %4513 = vmatprep.mubr.msk.f32.mxu0 %vm440_vm0, %v301_v6  ;;  %v304_v9 = vld [vmem:[%s5344_s6 + $0x18] sm:$0xff]  ;;  %v305_v10 = vld [vmem:[%s5344_s6 + $0x20] sm:$0xff]  ;;  %v306_v11 = vld [vmem:[%s5344_s6 + $0x28] sm:$0xff]  ;;  %4932 = vmatpush3.bf16.msra.mxu1 %v4929_v29 }
  0x1d   : > { %4514 = vmatmul.mubr.msk.f32.vlgmr.msra.gmra.mrb[0].mxu0 %vm440_vm0, %v302_v7  ;;  %v307_v12 = vld [vmem:[%s5344_s6 + $0x30] sm:$0xff]  ;;  %v308_v13 = vld [vmem:[%s5344_s6 + $0x38] sm:$0xff]  ;;  %v309_v14 = vld [vmem:[%s5344_s6 + $0x40] sm:$0xff]  ;;  %4934 = vmatprep.subr.bf16.mxu1 %v4933_v62  ;;  %p5181_p3 = pnand %p5180_p2, %p5174_p13 }
  0x1e   : > { %4516 = vmatprep.mubr.msk.f32.mxu0 %vm440_vm0, %v303_v8  ;;  %v310_v15 = vld [vmem:[%s5344_s6 + $0x48] sm:$0xff]  ;;  %v311_v16 = vld [vmem:[%s5344_s6 + $0x50] sm:$0xff]  ;;  %v312_v17 = vld [vmem:[%s5344_s6 + $0x58] sm:$0xff] }
  0x1f   : > { %v313_v18 = vld [vmem:[%s5344_s6 + $0x60] sm:$0xff]  ;;  %v314_v23 = vld [vmem:[%s5344_s6 + $0x68] sm:$0xff]  ;;  %v315_v25 = vld [vmem:[%s5344_s6 + $0x70] sm:$0xff] }
  0x20   : > { %v316_v30 = vld [vmem:[%s5344_s6 + $0x78] sm:$0xff]  ;;  %v317_v31 = vld [vmem:[%s5344_s6 + $0x80] sm:$0xff]  ;;  %v318_v32 = vld [vmem:[%s5344_s6 + $0x88] sm:$0xff]  ;;  %4936 = vmatpush3.bf16.msra.mxu1 %v4933_v62 }
  0x21   : > { %4517 = vmatmul.mubr.msk.f32.gmra.mrb[2].mxu0 %vm440_vm0, %v304_v9  ;;  %v319_v33 = vld [vmem:[%s5344_s6 + $0x90] sm:$0xff]  ;;  %v320_v34 = vld [vmem:[%s5344_s6 + $0x98] sm:$0xff]  ;;  %v321_v35 = vld [vmem:[%s5344_s6 + $0xa0] sm:$0xff] }
  0x22   : > { %4519 = vmatprep.mubr.msk.f32.mxu0 %vm440_vm0, %v305_v10  ;;  %v322_v36 = vld [vmem:[%s5344_s6 + $0xa8] sm:$0xff]  ;;  %v323_v37 = vld [vmem:[%s5344_s6 + $0xb0] sm:$0xff]  ;;  %v324_v38 = vld [vmem:[%s5344_s6 + $0xb8] sm:$0xff] }
  0x23   : > { %v325_v39 = vld [vmem:[%s5344_s6 + $0xc0] sm:$0xff]  ;;  %v326_v40 = vld [vmem:[%s5344_s6 + $0xc8] sm:$0xff]  ;;  %v327_v41 = vld [vmem:[%s5344_s6 + $0xd0] sm:$0xff] }
  0x24   : > { %v328_v42 = vld [vmem:[%s5344_s6 + $0xd8] sm:$0xff]  ;;  %v329_v43 = vld [vmem:[%s5344_s6 + $0xe0] sm:$0xff]  ;;  %v330_v44 = vld [vmem:[%s5344_s6 + $0xe8] sm:$0xff] }
  0x25   : > { %4520 = vmatmul.mubr.msk.f32.gmra.mrb[4].mxu0 %vm440_vm0, %v306_v11  ;;  %v331_v45 = vld [vmem:[%s5344_s6 + $0xf0] sm:$0xff]  ;;  %v332_v46 = vld [vmem:[%s5344_s6 + $0xf8] sm:$0xff]  ;;  %v333_v47 = vld [vmem:[%s5344_s6 + $0x100] sm:$0xff] }
  0x26   : > { %4522 = vmatprep.mubr.msk.f32.mxu0 %vm440_vm0, %v307_v12  ;;  %v334_v48 = vld [vmem:[%s5344_s6 + $0x108] sm:$0xff]  ;;  %v335_v49 = vld [vmem:[%s5344_s6 + $0x110] sm:$0xff]  ;;  %v336_v50 = vld [vmem:[%s5344_s6 + $0x118] sm:$0xff] }
  0x27   : > { %v337_v51 = vld [vmem:[%s5344_s6 + $0x120] sm:$0xff]  ;;  %v338_v52 = vld [vmem:[%s5344_s6 + $0x128] sm:$0xff]  ;;  %v339_v53 = vld [vmem:[%s5344_s6 + $0x130] sm:$0xff] }
  0x28   : > { %v340_v54 = vld [vmem:[%s5344_s6 + $0x138] sm:$0xff]  ;;  %v341_v55 = vld [vmem:[%s5344_s6 + $0x140] sm:$0xff]  ;;  %v342_v56 = vld [vmem:[%s5344_s6 + $0x148] sm:$0xff] }
  0x29   : > { %4523 = vmatmul.mubr.msk.f32.gmra.mrb[6].mxu0 %vm440_vm0, %v308_v13  ;;  %v343_v57 = vld [vmem:[%s5344_s6 + $0x150] sm:$0xff]  ;;  %v344_v58 = vld [vmem:[%s5344_s6 + $0x158] sm:$0xff]  ;;  %v345_v59 = vld [vmem:[%s5344_s6 + $0x160] sm:$0xff] }
  0x2a   : > { %4525 = vmatprep.mubr.msk.f32.mxu0 %vm440_vm0, %v309_v14  ;;  %v346_v63 = vld [vmem:[%s5344_s6 + $0x168] sm:$0xff]  ;;  %v347_v0 = vld [vmem:[%s5344_s6 + $0x170] sm:$0xff]  ;;  %v348_v1 = vld [vmem:[%s5344_s6 + $0x178] sm:$0xff] }
  0x2b   : > { %v349_v2 = vld [vmem:[%s5344_s6 + $0x180] sm:$0xff]  ;;  %v350_v3 = vld [vmem:[%s5344_s6 + $0x188] sm:$0xff]  ;;  %v351_v4 = vld [vmem:[%s5344_s6 + $0x190] sm:$0xff] }
  0x2c   : > { %v352_v5 = vld [vmem:[%s5344_s6 + $0x198] sm:$0xff]  ;;  %v353_v6 = vld [vmem:[%s5344_s6 + $0x1a0] sm:$0xff]  ;;  %v354_v7 = vld [vmem:[%s5344_s6 + $0x1a8] sm:$0xff] }
  0x2d   : > { %4526 = vmatmul.mubr.msk.f32.gmra.mrb[8].mxu0 %vm440_vm0, %v310_v15  ;;  %v355_v8 = vld [vmem:[%s5344_s6 + $0x1b0] sm:$0xff]  ;;  %v356_v9 = vld [vmem:[%s5344_s6 + $0x1b8] sm:$0xff]  ;;  %v357_v10 = vld [vmem:[%s5344_s6 + $0x1c0] sm:$0xff] }
  0x2e   : > { %4528 = vmatprep.mubr.msk.f32.mxu0 %vm440_vm0, %v311_v16  ;;  %v358_v11 = vld [vmem:[%s5344_s6 + $0x1c8] sm:$0xff]  ;;  %v359_v12 = vld [vmem:[%s5344_s6 + $0x1d0] sm:$0xff]  ;;  %v360_v13 = vld [vmem:[%s5344_s6 + $0x1d8] sm:$0xff] }
  0x2f   : > { %v361_v14 = vld [vmem:[%s5344_s6 + $0x1e0] sm:$0xff]  ;;  %v362_v15 = vld [vmem:[%s5344_s6 + $0x1e8] sm:$0xff]  ;;  %v363_v16 = vld [vmem:[%s5344_s6 + $0x1f0] sm:$0xff] }
  0x30   : > { %v366_v19 = vld [vmem:[%s5344_s6 + $0x208] sm:$0xff]  ;;  %v367_v20 = vld [vmem:[%s5344_s6 + $0x210] sm:$0xff]  ;;  %v368_v21 = vld [vmem:[%s5344_s6 + $0x218] sm:$0xff] }
  0x31   : > { %4529 = vmatmul.mubr.msk.f32.gmra.mrb[10].mxu0 %vm440_vm0, %v312_v17  ;;  %v364_v17 = vld [vmem:[%s5344_s6 + $0x1f8] sm:$0xff]  ;;  %v369_v22 = vld [vmem:[%s5344_s6 + $0x220] sm:$0xff]  ;;  %v371_v24 = vld [vmem:[%s5344_s6 + $0x230] sm:$0xff] }
  0x32   : > { %4531 = vmatprep.mubr.msk.f32.mxu0 %vm440_vm0, %v313_v18  ;;  %v365_v18 = vld [vmem:[%s5344_s6 + $0x200] sm:$0xff]  ;;  %v374_v27 = vld [vmem:[%s5344_s6 + $0x248] sm:$0xff]  ;;  %v375_v28 = vld [vmem:[%s5344_s6 + $0x250] sm:$0xff] }
  0x33   : > { %v373_v26 = vld [vmem:[%s5344_s6 + $0x240] sm:$0xff]  ;;  %v376_v29 = vld [vmem:[%s5344_s6 + $0x258] sm:$0xff]  ;;  %v407_v60 = vld [vmem:[%s5344_s6 + $0x350] sm:$0xff] }
  0x34   : > { %v408_v62 = vld [vmem:[%s5344_s6 + $0x358] sm:$0xff] }
  0x35   : > { %4532 = vmatmul.mubr.msk.f32.gmra.mrb[12].mxu0 %vm440_vm0, %v314_v23  ;;  %v370_v23 = vld [vmem:[%s5344_s6 + $0x228] sm:$0xff] }
  0x36   : > { %4534 = vmatprep.mubr.msk.f32.mxu0 %vm440_vm0, %v315_v25  ;;  %v372_v25 = vld [vmem:[%s5344_s6 + $0x238] sm:$0xff] }
  0x39   : > { %4535 = vmatmul.mubr.msk.f32.gmra.mrb[14].mxu0 %vm440_vm0, %v316_v30  ;;  %v377_v30 = vld [vmem:[%s5344_s6 + $0x260] sm:$0xff] }
  0x3a   : > { %4537 = vmatprep.mubr.msk.f32.mxu0 %vm440_vm0, %v317_v31  ;;  %v378_v31 = vld [vmem:[%s5344_s6 + $0x268] sm:$0xff] }
  0x3d   : > { %4538 = vmatmul.mubr.msk.f32.gmra.mrb[16].mxu0 %vm440_vm0, %v318_v32  ;;  %v379_v32 = vld [vmem:[%s5344_s6 + $0x270] sm:$0xff] }
  0x3e   : > { %4540 = vmatprep.mubr.msk.f32.mxu0 %vm440_vm0, %v319_v33  ;;  %v380_v33 = vld [vmem:[%s5344_s6 + $0x278] sm:$0xff] }
  0x41   : > { %4541 = vmatmul.mubr.msk.f32.gmra.mrb[18].mxu0 %vm440_vm0, %v320_v34  ;;  %v381_v34 = vld [vmem:[%s5344_s6 + $0x280] sm:$0xff] }
  0x42   : > { %4543 = vmatprep.mubr.msk.f32.mxu0 %vm440_vm0, %v321_v35  ;;  %v382_v35 = vld [vmem:[%s5344_s6 + $0x288] sm:$0xff] }
  0x45   : > { %4544 = vmatmul.mubr.msk.f32.gmra.mrb[20].mxu0 %vm440_vm0, %v322_v36  ;;  %v383_v36 = vld [vmem:[%s5344_s6 + $0x290] sm:$0xff] }
  0x46   : > { %4546 = vmatprep.mubr.msk.f32.mxu0 %vm440_vm0, %v323_v37  ;;  %v384_v37 = vld [vmem:[%s5344_s6 + $0x298] sm:$0xff] }
  0x49   : > { %4547 = vmatmul.mubr.msk.f32.gmra.mrb[22].mxu0 %vm440_vm0, %v324_v38  ;;  %v385_v38 = vld [vmem:[%s5344_s6 + $0x2a0] sm:$0xff] }
  0x4a   : > { %4549 = vmatprep.mubr.msk.f32.mxu0 %vm440_vm0, %v325_v39  ;;  %v386_v39 = vld [vmem:[%s5344_s6 + $0x2a8] sm:$0xff] }
  0x4d   : > { %4550 = vmatmul.mubr.msk.f32.gmra.mrb[24].mxu0 %vm440_vm0, %v326_v40  ;;  %v387_v40 = vld [vmem:[%s5344_s6 + $0x2b0] sm:$0xff] }
  0x4e   : > { %4552 = vmatprep.mubr.msk.f32.mxu0 %vm440_vm0, %v327_v41  ;;  %v388_v41 = vld [vmem:[%s5344_s6 + $0x2b8] sm:$0xff] }
  0x51   : > { %4553 = vmatmul.mubr.msk.f32.gmra.mrb[26].mxu0 %vm440_vm0, %v328_v42  ;;  %v389_v42 = vld [vmem:[%s5344_s6 + $0x2c0] sm:$0xff] }
  0x52   : > { %4555 = vmatprep.mubr.msk.f32.mxu0 %vm440_vm0, %v329_v43  ;;  %v390_v43 = vld [vmem:[%s5344_s6 + $0x2c8] sm:$0xff] }
  0x55   : > { %4556 = vmatmul.mubr.msk.f32.gmra.mrb[28].mxu0 %vm440_vm0, %v330_v44  ;;  %v391_v44 = vld [vmem:[%s5344_s6 + $0x2d0] sm:$0xff] }
  0x56   : > { %4558 = vmatprep.mubr.msk.f32.mxu0 %vm440_vm0, %v331_v45  ;;  %v392_v45 = vld [vmem:[%s5344_s6 + $0x2d8] sm:$0xff] }
  0x59   : > { %4559 = vmatmul.mubr.msk.f32.gmra.mrb[30].mxu0 %vm440_vm0, %v332_v46  ;;  %v393_v46 = vld [vmem:[%s5344_s6 + $0x2e0] sm:$0xff] }
  0x5a   : > { %4561 = vmatprep.mubr.msk.f32.mxu0 %vm440_vm0, %v333_v47  ;;  %v394_v47 = vld [vmem:[%s5344_s6 + $0x2e8] sm:$0xff] }
  0x5d   : > { %4562 = vmatmul.mubr.msk.f32.gmra.mrb[32].mxu0 %vm440_vm0, %v334_v48  ;;  %v395_v48 = vld [vmem:[%s5344_s6 + $0x2f0] sm:$0xff] }
  0x5e   : > { %4564 = vmatprep.mubr.msk.f32.mxu0 %vm440_vm0, %v335_v49  ;;  %v396_v49 = vld [vmem:[%s5344_s6 + $0x2f8] sm:$0xff] }
  0x61   : > { %4565 = vmatmul.mubr.msk.f32.gmra.mrb[34].mxu0 %vm440_vm0, %v336_v50  ;;  %v397_v50 = vld [vmem:[%s5344_s6 + $0x300] sm:$0xff] }
  0x62   : > { %4567 = vmatprep.mubr.msk.f32.mxu0 %vm440_vm0, %v337_v51  ;;  %v398_v51 = vld [vmem:[%s5344_s6 + $0x308] sm:$0xff] }
  0x65   : > { %4568 = vmatmul.mubr.msk.f32.gmra.mrb[36].mxu0 %vm440_vm0, %v338_v52  ;;  %v399_v52 = vld [vmem:[%s5344_s6 + $0x310] sm:$0xff] }
  0x66   : > { %4570 = vmatprep.mubr.msk.f32.mxu0 %vm440_vm0, %v339_v53  ;;  %v400_v53 = vld [vmem:[%s5344_s6 + $0x318] sm:$0xff] }
  0x69   : > { %4571 = vmatmul.mubr.msk.f32.gmra.mrb[38].mxu0 %vm440_vm0, %v340_v54  ;;  %v401_v54 = vld [vmem:[%s5344_s6 + $0x320] sm:$0xff] }
  0x6a   : > { %4573 = vmatprep.mubr.msk.f32.mxu0 %vm440_vm0, %v341_v55  ;;  %v402_v55 = vld [vmem:[%s5344_s6 + $0x328] sm:$0xff] }
  0x6d   : > { %4574 = vmatmul.mubr.msk.f32.gmra.mrb[40].mxu0 %vm440_vm0, %v342_v56  ;;  %v403_v56 = vld [vmem:[%s5344_s6 + $0x330] sm:$0xff] }
  0x6e   : > { %4576 = vmatprep.mubr.msk.f32.mxu0 %vm440_vm0, %v343_v57  ;;  %v404_v57 = vld [vmem:[%s5344_s6 + $0x338] sm:$0xff] }
  0x71   : > { %4577 = vmatmul.mubr.msk.f32.gmra.mrb[42].mxu0 %vm440_vm0, %v344_v58  ;;  %v405_v58 = vld [vmem:[%s5344_s6 + $0x340] sm:$0xff] }
  0x72   : > { %4579 = vmatprep.mubr.msk.f32.mxu0 %vm440_vm0, %v345_v59  ;;  %v406_v59 = vld [vmem:[%s5344_s6 + $0x348] sm:$0xff] }
  0x75   : > { %4580 = vmatmul.mubr.msk.f32.gmra.mrb[44].mxu0 %vm440_vm0, %v346_v63  ;;  %v409_v63 = vld [vmem:[%s5344_s6 + $0x360] sm:$0xff] }
  0x76   : > { %4582 = vmatprep.mubr.msk.f32.mxu0 %vm440_vm0, %v347_v0 }
  0x79   : > { %4583 = vmatmul.mubr.msk.f32.gmra.mrb[46].mxu0 %vm440_vm0, %v348_v1 }
  0x7a   : > { %4585 = vmatprep.mubr.msk.f32.mxu0 %vm440_vm0, %v349_v2 }
  0x7d   : > { %4586 = vmatmul.mubr.msk.f32.gmra.mrb[48].mxu0 %vm440_vm0, %v350_v3 }
  0x7e   : > { %4588 = vmatprep.mubr.msk.f32.mxu0 %vm440_vm0, %v351_v4  ;;  %v410_v4 = vld [vmem:[%s5344_s6 + $0x368] sm:$0xff] }
  0x81   : > { %4589 = vmatmul.mubr.msk.f32.gmra.mrb[50].mxu0 %vm440_vm0, %v352_v5  ;;  %v411_v5 = vld [vmem:[%s5344_s6 + $0x370] sm:$0xff] }
  0x82   : > { %4591 = vmatprep.mubr.msk.f32.mxu0 %vm440_vm0, %v353_v6 }
  0x85   : > { %4592 = vmatmul.mubr.msk.f32.gmra.mrb[52].mxu0 %vm440_vm0, %v354_v7 }
  0x86   : > { %4594 = vmatprep.mubr.msk.f32.mxu0 %vm440_vm0, %v355_v8 }
  0x89   : > { %4595 = vmatmul.mubr.msk.f32.gmra.mrb[54].mxu0 %vm440_vm0, %v356_v9 }
  0x8a   : > { %4597 = vmatprep.mubr.msk.f32.mxu0 %vm440_vm0, %v357_v10 }
  0x8d   : > { %4598 = vmatmul.mubr.msk.f32.gmra.mrb[56].mxu0 %vm440_vm0, %v358_v11 }
  0x8e   : > { %4600 = vmatprep.mubr.msk.f32.mxu0 %vm440_vm0, %v359_v12  ;;  %v412_v12 = vld [vmem:[%s5344_s6 + $0x378] sm:$0xff] }
  0x91   : > { %4601 = vmatmul.mubr.msk.f32.gmra.mrb[58].mxu0 %vm440_vm0, %v360_v13  ;;  %v413_v13 = vld [vmem:[%s5344_s6 + $0x380] sm:$0xff] }
  0x92   : > { %4603 = vmatprep.mubr.msk.f32.mxu0 %vm440_vm0, %v361_v14 }
  0x95   : > { %4604 = vmatmul.mubr.msk.f32.gmra.mrb[60].mxu0 %vm440_vm0, %v362_v15 }
  0x96   : > { %4606 = vmatprep.mubr.msk.f32.mxu0 %vm440_vm0, %v363_v16 }
  0x99   : > { %4607 = vmatmul.mubr.msk.f32.gmra.mrb[62].mxu0 %vm440_vm0, %v364_v17 }
  0x9a   : > { %4609 = vmatprep.mubr.msk.f32.mxu0 %vm440_vm0, %v365_v18 }
  0x9d   : > { %4610 = vmatmul.mubr.msk.f32.gmra.mrb[64].mxu0 %vm440_vm0, %v366_v19 }
  0x9e   : > { %4612 = vmatprep.mubr.msk.f32.mxu0 %vm440_vm0, %v367_v20  ;;  %v414_v20 = vld [vmem:[%s5344_s6 + $0x388] sm:$0xff] }
  0xa1   : > { %4613 = vmatmul.mubr.msk.f32.gmra.mrb[66].mxu0 %vm440_vm0, %v368_v21  ;;  %v415_v21 = vld [vmem:[%s5344_s6 + $0x390] sm:$0xff] }
  0xa2   : > { %4615 = vmatprep.mubr.msk.f32.mxu0 %vm440_vm0, %v369_v22 }
  0xa5   : > { %4616 = vmatmul.mubr.msk.f32.gmra.mrb[68].mxu0 %vm440_vm0, %v370_v23 }
  0xa6   : > { %4618 = vmatprep.mubr.msk.f32.mxu0 %vm440_vm0, %v371_v24 }
  0xa9   : > { %4619 = vmatmul.mubr.msk.f32.gmra.mrb[70].mxu0 %vm440_vm0, %v372_v25 }
  0xaa   : > { %4621 = vmatprep.mubr.msk.f32.mxu0 %vm440_vm0, %v373_v26 }
  0xad   : > { %4622 = vmatmul.mubr.msk.f32.gmra.mrb[72].mxu0 %vm440_vm0, %v374_v27 }
  0xae   : > { %4624 = vmatprep.mubr.msk.f32.mxu0 %vm440_vm0, %v375_v28  ;;  %v416_v28 = vld [vmem:[%s5344_s6 + $0x398] sm:$0xff] }
  0xb1   : > { %4625 = vmatmul.mubr.msk.f32.gmra.mrb[74].mxu0 %vm440_vm0, %v376_v29  ;;  %v417_v29 = vld [vmem:[%s5344_s6 + $0x3a0] sm:$0xff] }
  0xb2   : > { %4627 = vmatprep.mubr.msk.f32.mxu0 %vm440_vm0, %v377_v30 }
  0xb5   : > { %4628 = vmatmul.mubr.msk.f32.gmra.mrb[76].mxu0 %vm440_vm0, %v378_v31 }
  0xb6   : > { %4630 = vmatprep.mubr.msk.f32.mxu0 %vm440_vm0, %v379_v32 }
  0xb9   : > { %4631 = vmatmul.mubr.msk.f32.gmra.mrb[78].mxu0 %vm440_vm0, %v380_v33 }
  0xba   : > { %4633 = vmatprep.mubr.msk.f32.mxu0 %vm440_vm0, %v381_v34 }
  0xbd   : > { %4634 = vmatmul.mubr.msk.f32.gmra.mrb[80].mxu0 %vm440_vm0, %v382_v35 }
  0xbe   : > { %4636 = vmatprep.mubr.msk.f32.mxu0 %vm440_vm0, %v383_v36  ;;  %v418_v36 = vld [vmem:[%s5344_s6 + $0x3a8] sm:$0xff] }
  0xc1   : > { %4637 = vmatmul.mubr.msk.f32.gmra.mrb[82].mxu0 %vm440_vm0, %v384_v37  ;;  %v419_v37 = vld [vmem:[%s5344_s6 + $0x3b0] sm:$0xff] }
  0xc2   : > { %4639 = vmatprep.mubr.msk.f32.mxu0 %vm440_vm0, %v385_v38 }
  0xc5   : > { %4640 = vmatmul.mubr.msk.f32.gmra.mrb[84].mxu0 %vm440_vm0, %v386_v39 }
  0xc6   : > { %4642 = vmatprep.mubr.msk.f32.mxu0 %vm440_vm0, %v387_v40 }
  0xc9   : > { %4643 = vmatmul.mubr.msk.f32.gmra.mrb[86].mxu0 %vm440_vm0, %v388_v41 }
  0xca   : > { %4645 = vmatprep.mubr.msk.f32.mxu0 %vm440_vm0, %v389_v42 }
  0xcd   : > { %4646 = vmatmul.mubr.msk.f32.gmra.mrb[88].mxu0 %vm440_vm0, %v390_v43 }
  0xce   : > { %4648 = vmatprep.mubr.msk.f32.mxu0 %vm440_vm0, %v391_v44  ;;  %v420_v44 = vld [vmem:[%s5344_s6 + $0x3b8] sm:$0xff] }
  0xd1   : > { %4649 = vmatmul.mubr.msk.f32.gmra.mrb[90].mxu0 %vm440_vm0, %v392_v45  ;;  %v421_v45 = vld [vmem:[%s5344_s6 + $0x3c0] sm:$0xff] }
  0xd2   : > { %4651 = vmatprep.mubr.msk.f32.mxu0 %vm440_vm0, %v393_v46 }
  0xd5   : > { %4652 = vmatmul.mubr.msk.f32.gmra.mrb[92].mxu0 %vm440_vm0, %v394_v47 }
  0xd6   : > { %4654 = vmatprep.mubr.msk.f32.mxu0 %vm440_vm0, %v395_v48 }
  0xd9   : > { %4655 = vmatmul.mubr.msk.f32.gmra.mrb[94].mxu0 %vm440_vm0, %v396_v49 }
  0xda   : > { %4657 = vmatprep.mubr.msk.f32.mxu0 %vm440_vm0, %v397_v50 }
  0xdd   : > { %4658 = vmatmul.mubr.msk.f32.gmra.mrb[96].mxu0 %vm440_vm0, %v398_v51 }
  0xde   : > { %4660 = vmatprep.mubr.msk.f32.mxu0 %vm440_vm0, %v399_v52  ;;  %v422_v52 = vld [vmem:[%s5344_s6 + $0x3c8] sm:$0xff] }
  0xe1   : > { %4661 = vmatmul.mubr.msk.f32.gmra.mrb[98].mxu0 %vm440_vm0, %v400_v53  ;;  %v423_v53 = vld [vmem:[%s5344_s6 + $0x3d0] sm:$0xff] }
  0xe2   : > { %4663 = vmatprep.mubr.msk.f32.mxu0 %vm440_vm0, %v401_v54 }
  0xe5   : > { %4664 = vmatmul.mubr.msk.f32.gmra.mrb[100].mxu0 %vm440_vm0, %v402_v55 }
  0xe6   : > { %4666 = vmatprep.mubr.msk.f32.mxu0 %vm440_vm0, %v403_v56 }
  0xe9   : > { %4667 = vmatmul.mubr.msk.f32.gmra.mrb[102].mxu0 %vm440_vm0, %v404_v57 }
  0xea   : > { %4669 = vmatprep.mubr.msk.f32.mxu0 %vm440_vm0, %v405_v58 }
  0xed   : > { %4670 = vmatmul.mubr.msk.f32.gmra.mrb[104].mxu0 %vm440_vm0, %v406_v59 }
  0xee   : > { %4672 = vmatprep.mubr.msk.f32.mxu0 %vm440_vm0, %v407_v60  ;;  %v424_v60 = vld [vmem:[%s5344_s6 + $0x3d8] sm:$0xff] }
  0xf0   : > { %v4515_v0 = vpop.f32.mrb[0].mxu0 }
  0xf1   : > { %v897_v1 = vadd.f32 %v4515_v0, %v5586_v61  ;;  %v891_v2 = vpop.f32.mrb[1].mxu0  ;;  %4673 = vmatmul.mubr.msk.f32.gmra.mrb[106].mxu0 %vm440_vm0, %v408_v62  ;;  %v425_v62 = vld [vmem:[%s5344_s6 + $0x3e0] sm:$0xff] }
  0xf2   : > { %v892_v3 = vadd.f32 %v5586_v61, %v891_v2  ;;  %4675 = vmatprep.mubr.msk.f32.mxu0 %vm440_vm0, %v409_v63 }
  0xf3   : > { %v1531_v8 = vmax.f32 %v897_v1, 0.0 }
  0xf4   : > { %v1530_v6 = vmax.f32 %v892_v3, 0.0  ;;  %v4518_v7 = vpop.f32.mrb[2].mxu0 }
  0xf5   : > { %v907_v9 = vadd.f32 %v4518_v7, %v5586_v61  ;;  %v901_v10 = vpop.f32.mrb[3].mxu0  ;;  %4676 = vmatmul.mubr.msk.f32.gmra.mrb[108].mxu0 %vm440_vm0, %v410_v4 }
  0xf6   : > { %v902_v11 = vadd.f32 %v5586_v61, %v901_v10  ;;  %4721 = vmatprep.mubr.msk.f32.mxu1 %vm1673_vm1, %v1530_v6  ;;  %4678 = vmatprep.mubr.msk.f32.mxu0 %vm440_vm0, %v411_v5  ;;  %v426_v5 = vld [vmem:[%s5344_s6 + $0x3e8] sm:$0xff]  ;;  %v427_v6 = vld [vmem:[%s5344_s6 + $0x3f0] sm:$0xff] }
  0xf7   : > { %4722 = vmatmul.mubr.msk.f32.vlgmr.msra.gmra.mrb[0].mxu1 %vm1673_vm1, %v1531_v8  ;;  %v1533_v16 = vmax.f32 %v907_v9, 0.0 }
  0xf8   : > { %v1532_v14 = vmax.f32 %v902_v11, 0.0  ;;  %v4521_v15 = vpop.f32.mrb[4].mxu0 }
  0xf9   : > { %v917_v17 = vadd.f32 %v4521_v15, %v5586_v61  ;;  %v911_v18 = vpop.f32.mrb[5].mxu0  ;;  %4679 = vmatmul.mubr.msk.f32.gmra.mrb[110].mxu0 %vm440_vm0, %v412_v12 }
  0xfa   : > { %v912_v19 = vadd.f32 %v5586_v61, %v911_v18  ;;  %4724 = vmatprep.mubr.msk.f32.mxu1 %vm1673_vm1, %v1532_v14  ;;  %4681 = vmatprep.mubr.msk.f32.mxu0 %vm440_vm0, %v413_v13  ;;  %v428_v13 = vld [vmem:[%s5344_s6 + $0x3f8] sm:$0xff]  ;;  %s6286_s6 = scalar_lea.hbm %s6335_s7, %s5334_s20 }
  0xfb   : > { %4725 = vmatmul.mubr.msk.f32.gmra.mrb[2].mxu1 %vm1673_vm1, %v1533_v16  ;;  %v1535_v24 = vmax.f32 %v917_v17, 0.0 }
  0xfc   : > { %v1534_v22 = vmax.f32 %v912_v19, 0.0  ;;  %v4524_v23 = vpop.f32.mrb[6].mxu0 }
  0xfd   : > { %v927_v25 = vadd.f32 %v4524_v23, %v5586_v61  ;;  %v921_v26 = vpop.f32.mrb[7].mxu0  ;;  %4682 = vmatmul.mubr.msk.f32.gmra.mrb[112].mxu0 %vm440_vm0, %v414_v20 }
  0xfe   : > { %v922_v27 = vadd.f32 %v5586_v61, %v921_v26  ;;  %4727 = vmatprep.mubr.msk.f32.mxu1 %vm1673_vm1, %v1534_v22  ;;  %4684 = vmatprep.mubr.msk.f32.mxu0 %vm440_vm0, %v415_v21 }
  0xff   : > { %4728 = vmatmul.mubr.msk.f32.gmra.mrb[4].mxu1 %vm1673_vm1, %v1535_v24  ;;  %v1537_v32 = vmax.f32 %v927_v25, 0.0 }
 0x100   : > { %v1536_v30 = vmax.f32 %v922_v27, 0.0  ;;  %v4527_v31 = vpop.f32.mrb[8].mxu0 }
 0x101   : > { %v937_v33 = vadd.f32 %v4527_v31, %v5586_v61  ;;  %v931_v34 = vpop.f32.mrb[9].mxu0  ;;  %4685 = vmatmul.mubr.msk.f32.gmra.mrb[114].mxu0 %vm440_vm0, %v416_v28 }
 0x102   : > { %v932_v35 = vadd.f32 %v5586_v61, %v931_v34  ;;  %4730 = vmatprep.mubr.msk.f32.mxu1 %vm1673_vm1, %v1536_v30  ;;  %4687 = vmatprep.mubr.msk.f32.mxu0 %vm440_vm0, %v417_v29 }
 0x103   : > { %4731 = vmatmul.mubr.msk.f32.gmra.mrb[6].mxu1 %vm1673_vm1, %v1537_v32  ;;  %v1539_v40 = vmax.f32 %v937_v33, 0.0 }
 0x104   : > { %v1538_v38 = vmax.f32 %v932_v35, 0.0  ;;  %v4530_v39 = vpop.f32.mrb[10].mxu0 }
 0x105   : > { %v947_v41 = vadd.f32 %v4530_v39, %v5586_v61  ;;  %v941_v42 = vpop.f32.mrb[11].mxu0  ;;  %4688 = vmatmul.mubr.msk.f32.gmra.mrb[116].mxu0 %vm440_vm0, %v418_v36 }
 0x106   : > { %v942_v43 = vadd.f32 %v5586_v61, %v941_v42  ;;  %4733 = vmatprep.mubr.msk.f32.mxu1 %vm1673_vm1, %v1538_v38  ;;  %4690 = vmatprep.mubr.msk.f32.mxu0 %vm440_vm0, %v419_v37 }
 0x107   : > { %4734 = vmatmul.mubr.msk.f32.gmra.mrb[8].mxu1 %vm1673_vm1, %v1539_v40  ;;  %v1541_v48 = vmax.f32 %v947_v41, 0.0 }
 0x108   : > { %v1540_v46 = vmax.f32 %v942_v43, 0.0  ;;  %v4533_v47 = vpop.f32.mrb[12].mxu0 }
 0x109   : > { %v957_v49 = vadd.f32 %v4533_v47, %v5586_v61  ;;  %v951_v50 = vpop.f32.mrb[13].mxu0  ;;  %4691 = vmatmul.mubr.msk.f32.gmra.mrb[118].mxu0 %vm440_vm0, %v420_v44 }
 0x10a   : > { %v952_v51 = vadd.f32 %v5586_v61, %v951_v50  ;;  %4736 = vmatprep.mubr.msk.f32.mxu1 %vm1673_vm1, %v1540_v46  ;;  %4693 = vmatprep.mubr.msk.f32.mxu0 %vm440_vm0, %v421_v45 }
 0x10b   : > { %4737 = vmatmul.mubr.msk.f32.gmra.mrb[10].mxu1 %vm1673_vm1, %v1541_v48  ;;  %v1543_v56 = vmax.f32 %v957_v49, 0.0 }
 0x10c   : > { %v1542_v54 = vmax.f32 %v952_v51, 0.0  ;;  %v4536_v55 = vpop.f32.mrb[14].mxu0 }
 0x10d   : > { %v967_v57 = vadd.f32 %v4536_v55, %v5586_v61  ;;  %v961_v58 = vpop.f32.mrb[15].mxu0  ;;  %4694 = vmatmul.mubr.msk.f32.gmra.mrb[120].mxu0 %vm440_vm0, %v422_v52 }
 0x10e   : > { %v962_v59 = vadd.f32 %v5586_v61, %v961_v58  ;;  %4739 = vmatprep.mubr.msk.f32.mxu1 %vm1673_vm1, %v1542_v54  ;;  %4696 = vmatprep.mubr.msk.f32.mxu0 %vm440_vm0, %v423_v53 }
 0x10f   : > { %4740 = vmatmul.mubr.msk.f32.gmra.mrb[12].mxu1 %vm1673_vm1, %v1543_v56  ;;  %v1545_v1 = vmax.f32 %v967_v57, 0.0 }
 0x110   : > { %v1544_v63 = vmax.f32 %v962_v59, 0.0  ;;  %v4539_v0 = vpop.f32.mrb[16].mxu0 }
 0x111   : > { %v977_v2 = vadd.f32 %v4539_v0, %v5586_v61  ;;  %v971_v3 = vpop.f32.mrb[17].mxu0  ;;  %4697 = vmatmul.mubr.msk.f32.gmra.mrb[122].mxu0 %vm440_vm0, %v424_v60 }
 0x112   : > { %v972_v4 = vadd.f32 %v5586_v61, %v971_v3  ;;  %4742 = vmatprep.mubr.msk.f32.mxu1 %vm1673_vm1, %v1544_v63  ;;  %4699 = vmatprep.mubr.msk.f32.mxu0 %vm440_vm0, %v425_v62 }
 0x113   : > { %4743 = vmatmul.mubr.msk.f32.gmra.mrb[14].mxu1 %vm1673_vm1, %v1545_v1  ;;  %v1547_v9 = vmax.f32 %v977_v2, 0.0 }
 0x114   : > { %v1546_v7 = vmax.f32 %v972_v4, 0.0  ;;  %v4542_v8 = vpop.f32.mrb[18].mxu0 }
 0x115   : > { %v987_v10 = vadd.f32 %v4542_v8, %v5586_v61  ;;  %v981_v11 = vpop.f32.mrb[19].mxu0  ;;  %4700 = vmatmul.mubr.msk.f32.gmra.mrb[124].mxu0 %vm440_vm0, %v426_v5 }
 0x116   : > { %v982_v12 = vadd.f32 %v5586_v61, %v981_v11  ;;  %4745 = vmatprep.mubr.msk.f32.mxu1 %vm1673_vm1, %v1546_v7  ;;  %4702 = vmatprep.mubr.msk.f32.mxu0 %vm440_vm0, %v427_v6 }
 0x117   : > { %4746 = vmatmul.mubr.msk.f32.gmra.mrb[16].mxu1 %vm1673_vm1, %v1547_v9  ;;  %v1549_v16 = vmax.f32 %v987_v10, 0.0 }
 0x118   : > { %v1548_v14 = vmax.f32 %v982_v12, 0.0  ;;  %v4545_v15 = vpop.f32.mrb[20].mxu0 }
 0x119   : > { %v997_v17 = vadd.f32 %v4545_v15, %v5586_v61  ;;  %v991_v18 = vpop.f32.mrb[21].mxu0  ;;  %4703 = vmatmul.mubr.msk.f32.gmra.mrb[126].mxu0 %vm440_vm0, %v428_v13 }
 0x11a   : > { %v992_v19 = vadd.f32 %v5586_v61, %v991_v18  ;;  %4748 = vmatprep.mubr.msk.f32.mxu1 %vm1673_vm1, %v1548_v14 }
 0x11b   : > { %4749 = vmatmul.mubr.msk.f32.gmra.mrb[18].mxu1 %vm1673_vm1, %v1549_v16  ;;  %v1551_v22 = vmax.f32 %v997_v17, 0.0 }
 0x11c   : > { %v1550_v20 = vmax.f32 %v992_v19, 0.0  ;;  %v4548_v21 = vpop.f32.mrb[22].mxu0 }
 0x11d   : > { %v1007_v23 = vadd.f32 %v4548_v21, %v5586_v61  ;;  %v1001_v24 = vpop.f32.mrb[23].mxu0 }
 0x11e   : > { %v1002_v25 = vadd.f32 %v5586_v61, %v1001_v24  ;;  %4751 = vmatprep.mubr.msk.f32.mxu1 %vm1673_vm1, %v1550_v20 }
 0x11f   : > { %4752 = vmatmul.mubr.msk.f32.gmra.mrb[20].mxu1 %vm1673_vm1, %v1551_v22  ;;  %v1553_v28 = vmax.f32 %v1007_v23, 0.0 }
 0x120   : > { %v1552_v26 = vmax.f32 %v1002_v25, 0.0  ;;  %v4551_v27 = vpop.f32.mrb[24].mxu0 }
 0x121   : > { %v1017_v29 = vadd.f32 %v4551_v27, %v5586_v61  ;;  %v1011_v30 = vpop.f32.mrb[25].mxu0 }
 0x122   : > { %v1012_v31 = vadd.f32 %v5586_v61, %v1011_v30  ;;  %4754 = vmatprep.mubr.msk.f32.mxu1 %vm1673_vm1, %v1552_v26 }
 0x123   : > { %4755 = vmatmul.mubr.msk.f32.gmra.mrb[22].mxu1 %vm1673_vm1, %v1553_v28  ;;  %v1555_v34 = vmax.f32 %v1017_v29, 0.0 }
 0x124   : > { %v1554_v32 = vmax.f32 %v1012_v31, 0.0  ;;  %v4554_v33 = vpop.f32.mrb[26].mxu0 }
 0x125   : > { %v1027_v35 = vadd.f32 %v4554_v33, %v5586_v61  ;;  %v1021_v36 = vpop.f32.mrb[27].mxu0 }
 0x126   : > { %v1022_v37 = vadd.f32 %v5586_v61, %v1021_v36  ;;  %4757 = vmatprep.mubr.msk.f32.mxu1 %vm1673_vm1, %v1554_v32 }
 0x127   : > { %4758 = vmatmul.mubr.msk.f32.gmra.mrb[24].mxu1 %vm1673_vm1, %v1555_v34  ;;  %v1557_v40 = vmax.f32 %v1027_v35, 0.0 }
 0x128   : > { %v1556_v38 = vmax.f32 %v1022_v37, 0.0  ;;  %v4557_v39 = vpop.f32.mrb[28].mxu0 }
 0x129   : > { %v1037_v41 = vadd.f32 %v4557_v39, %v5586_v61  ;;  %v1031_v42 = vpop.f32.mrb[29].mxu0 }
 0x12a   : > { %v1032_v43 = vadd.f32 %v5586_v61, %v1031_v42  ;;  %4760 = vmatprep.mubr.msk.f32.mxu1 %vm1673_vm1, %v1556_v38 }
 0x12b   : > { %4761 = vmatmul.mubr.msk.f32.gmra.mrb[26].mxu1 %vm1673_vm1, %v1557_v40  ;;  %v1559_v46 = vmax.f32 %v1037_v41, 0.0 }
 0x12c   : > { %v1558_v44 = vmax.f32 %v1032_v43, 0.0  ;;  %v4560_v45 = vpop.f32.mrb[30].mxu0 }
 0x12d   : > { %v1047_v47 = vadd.f32 %v4560_v45, %v5586_v61  ;;  %v1041_v48 = vpop.f32.mrb[31].mxu0 }
 0x12e   : > { %v1042_v49 = vadd.f32 %v5586_v61, %v1041_v48  ;;  %4763 = vmatprep.mubr.msk.f32.mxu1 %vm1673_vm1, %v1558_v44 }
 0x12f   : > { %4764 = vmatmul.mubr.msk.f32.gmra.mrb[28].mxu1 %vm1673_vm1, %v1559_v46  ;;  %v1561_v52 = vmax.f32 %v1047_v47, 0.0 }
 0x130   : > { %v1560_v50 = vmax.f32 %v1042_v49, 0.0  ;;  %v4563_v51 = vpop.f32.mrb[32].mxu0 }
 0x131   : > { %v1057_v53 = vadd.f32 %v4563_v51, %v5586_v61  ;;  %v1051_v54 = vpop.f32.mrb[33].mxu0 }
 0x132   : > { %v1052_v55 = vadd.f32 %v5586_v61, %v1051_v54  ;;  %4766 = vmatprep.mubr.msk.f32.mxu1 %vm1673_vm1, %v1560_v50 }
 0x133   : > { %4767 = vmatmul.mubr.msk.f32.gmra.mrb[30].mxu1 %vm1673_vm1, %v1561_v52  ;;  %v1563_v58 = vmax.f32 %v1057_v53, 0.0 }
 0x134   : > { %v1562_v56 = vmax.f32 %v1052_v55, 0.0  ;;  %v4566_v57 = vpop.f32.mrb[34].mxu0 }
 0x135   : > { %v1067_v59 = vadd.f32 %v4566_v57, %v5586_v61  ;;  %v1061_v60 = vpop.f32.mrb[35].mxu0 }
 0x136   : > { %v1062_v62 = vadd.f32 %v5586_v61, %v1061_v60  ;;  %4769 = vmatprep.mubr.msk.f32.mxu1 %vm1673_vm1, %v1562_v56 }
 0x137   : > { %4770 = vmatmul.mubr.msk.f32.gmra.mrb[32].mxu1 %vm1673_vm1, %v1563_v58  ;;  %v1565_v1 = vmax.f32 %v1067_v59, 0.0 }
 0x138   : > { %v1564_v63 = vmax.f32 %v1062_v62, 0.0  ;;  %v4569_v0 = vpop.f32.mrb[36].mxu0 }
 0x139   : > { %v1077_v2 = vadd.f32 %v4569_v0, %v5586_v61  ;;  %v1071_v3 = vpop.f32.mrb[37].mxu0 }
 0x13a   : > { %v1072_v4 = vadd.f32 %v5586_v61, %v1071_v3  ;;  %4772 = vmatprep.mubr.msk.f32.mxu1 %vm1673_vm1, %v1564_v63 }
 0x13b   : > { %4773 = vmatmul.mubr.msk.f32.gmra.mrb[34].mxu1 %vm1673_vm1, %v1565_v1  ;;  %v1567_v7 = vmax.f32 %v1077_v2, 0.0 }
 0x13c   : > { %v1566_v5 = vmax.f32 %v1072_v4, 0.0  ;;  %v4572_v6 = vpop.f32.mrb[38].mxu0 }
 0x13d   : > { %v1087_v8 = vadd.f32 %v4572_v6, %v5586_v61  ;;  %v1081_v9 = vpop.f32.mrb[39].mxu0 }
 0x13e   : > { %v1082_v10 = vadd.f32 %v5586_v61, %v1081_v9  ;;  %4775 = vmatprep.mubr.msk.f32.mxu1 %vm1673_vm1, %v1566_v5 }
 0x13f   : > { %4776 = vmatmul.mubr.msk.f32.gmra.mrb[36].mxu1 %vm1673_vm1, %v1567_v7  ;;  %v1569_v13 = vmax.f32 %v1087_v8, 0.0 }
 0x140   : > { %v1568_v11 = vmax.f32 %v1082_v10, 0.0  ;;  %v4575_v12 = vpop.f32.mrb[40].mxu0 }
 0x141   : > { %v1097_v14 = vadd.f32 %v4575_v12, %v5586_v61  ;;  %v1091_v15 = vpop.f32.mrb[41].mxu0 }
 0x142   : > { %v1092_v16 = vadd.f32 %v5586_v61, %v1091_v15  ;;  %4778 = vmatprep.mubr.msk.f32.mxu1 %vm1673_vm1, %v1568_v11 }
 0x143   : > { %4779 = vmatmul.mubr.msk.f32.gmra.mrb[38].mxu1 %vm1673_vm1, %v1569_v13  ;;  %v1571_v19 = vmax.f32 %v1097_v14, 0.0 }
 0x144   : > { %v1570_v17 = vmax.f32 %v1092_v16, 0.0  ;;  %v4578_v18 = vpop.f32.mrb[42].mxu0 }
 0x145   : > { %v1107_v20 = vadd.f32 %v4578_v18, %v5586_v61  ;;  %v1101_v21 = vpop.f32.mrb[43].mxu0 }
 0x146   : > { %v1102_v22 = vadd.f32 %v5586_v61, %v1101_v21  ;;  %4781 = vmatprep.mubr.msk.f32.mxu1 %vm1673_vm1, %v1570_v17 }
 0x147   : > { %4782 = vmatmul.mubr.msk.f32.gmra.mrb[40].mxu1 %vm1673_vm1, %v1571_v19  ;;  %v1573_v25 = vmax.f32 %v1107_v20, 0.0 }
 0x148   : > { %v1572_v23 = vmax.f32 %v1102_v22, 0.0  ;;  %v4581_v24 = vpop.f32.mrb[44].mxu0 }
 0x149   : > { %v1117_v26 = vadd.f32 %v4581_v24, %v5586_v61  ;;  %v1111_v27 = vpop.f32.mrb[45].mxu0 }
 0x14a   : > { %v1112_v28 = vadd.f32 %v5586_v61, %v1111_v27  ;;  %4784 = vmatprep.mubr.msk.f32.mxu1 %vm1673_vm1, %v1572_v23 }
 0x14b   : > { %4785 = vmatmul.mubr.msk.f32.gmra.mrb[42].mxu1 %vm1673_vm1, %v1573_v25  ;;  %v1575_v31 = vmax.f32 %v1117_v26, 0.0 }
 0x14c   : > { %v1574_v29 = vmax.f32 %v1112_v28, 0.0  ;;  %v4584_v30 = vpop.f32.mrb[46].mxu0 }
 0x14d   : > { %v1127_v32 = vadd.f32 %v4584_v30, %v5586_v61  ;;  %v1121_v33 = vpop.f32.mrb[47].mxu0 }
 0x14e   : > { %v1122_v34 = vadd.f32 %v5586_v61, %v1121_v33  ;;  %4787 = vmatprep.mubr.msk.f32.mxu1 %vm1673_vm1, %v1574_v29 }
 0x14f   : > { %4788 = vmatmul.mubr.msk.f32.gmra.mrb[44].mxu1 %vm1673_vm1, %v1575_v31  ;;  %v1577_v37 = vmax.f32 %v1127_v32, 0.0 }
 0x150   : > { %v1576_v35 = vmax.f32 %v1122_v34, 0.0  ;;  %v4587_v36 = vpop.f32.mrb[48].mxu0 }
 0x151   : > { %v1137_v38 = vadd.f32 %v4587_v36, %v5586_v61  ;;  %v1131_v39 = vpop.f32.mrb[49].mxu0 }
 0x152   : > { %v1132_v40 = vadd.f32 %v5586_v61, %v1131_v39  ;;  %4790 = vmatprep.mubr.msk.f32.mxu1 %vm1673_vm1, %v1576_v35 }
 0x153   : > { %4791 = vmatmul.mubr.msk.f32.gmra.mrb[46].mxu1 %vm1673_vm1, %v1577_v37  ;;  %v1579_v43 = vmax.f32 %v1137_v38, 0.0 }
 0x154   : > { %v1578_v41 = vmax.f32 %v1132_v40, 0.0  ;;  %v4590_v42 = vpop.f32.mrb[50].mxu0 }
 0x155   : > { %v1147_v44 = vadd.f32 %v4590_v42, %v5586_v61  ;;  %v1141_v45 = vpop.f32.mrb[51].mxu0 }
 0x156   : > { %4793 = vmatprep.mubr.msk.f32.mxu1 %vm1673_vm1, %v1578_v41  ;;  %v1142_v46 = vadd.f32 %v5586_v61, %v1141_v45 }
 0x157   : > { %4794 = vmatmul.mubr.msk.f32.gmra.mrb[48].mxu1 %vm1673_vm1, %v1579_v43  ;;  %v1581_v49 = vmax.f32 %v1147_v44, 0.0 }
 0x158   : > { %v1580_v47 = vmax.f32 %v1142_v46, 0.0  ;;  %v4593_v48 = vpop.f32.mrb[52].mxu0 }
 0x159   : > { %v1157_v50 = vadd.f32 %v4593_v48, %v5586_v61  ;;  %v1151_v51 = vpop.f32.mrb[53].mxu0 }
 0x15a   : > { %4796 = vmatprep.mubr.msk.f32.mxu1 %vm1673_vm1, %v1580_v47  ;;  %v1152_v52 = vadd.f32 %v5586_v61, %v1151_v51 }
 0x15b   : > { %4797 = vmatmul.mubr.msk.f32.gmra.mrb[50].mxu1 %vm1673_vm1, %v1581_v49  ;;  %v1583_v55 = vmax.f32 %v1157_v50, 0.0 }
 0x15c   : > { %v1582_v53 = vmax.f32 %v1152_v52, 0.0  ;;  %v4596_v54 = vpop.f32.mrb[54].mxu0 }
 0x15d   : > { %v1167_v56 = vadd.f32 %v4596_v54, %v5586_v61  ;;  %v1161_v57 = vpop.f32.mrb[55].mxu0 }
 0x15e   : > { %4799 = vmatprep.mubr.msk.f32.mxu1 %vm1673_vm1, %v1582_v53  ;;  %v1162_v58 = vadd.f32 %v5586_v61, %v1161_v57 }
 0x15f   : > { %4800 = vmatmul.mubr.msk.f32.gmra.mrb[52].mxu1 %vm1673_vm1, %v1583_v55  ;;  %v1585_v62 = vmax.f32 %v1167_v56, 0.0 }
 0x160   : > { %v1584_v59 = vmax.f32 %v1162_v58, 0.0  ;;  %v4599_v60 = vpop.f32.mrb[56].mxu0 }
 0x161   : > { %v1177_v63 = vadd.f32 %v4599_v60, %v5586_v61  ;;  %v1171_v0 = vpop.f32.mrb[57].mxu0 }
 0x162   : > { %4802 = vmatprep.mubr.msk.f32.mxu1 %vm1673_vm1, %v1584_v59  ;;  %v1172_v1 = vadd.f32 %v5586_v61, %v1171_v0 }
 0x163   : > { %4803 = vmatmul.mubr.msk.f32.gmra.mrb[54].mxu1 %vm1673_vm1, %v1585_v62  ;;  %v1587_v4 = vmax.f32 %v1177_v63, 0.0 }
 0x164   : > { %v1586_v2 = vmax.f32 %v1172_v1, 0.0  ;;  %v4602_v3 = vpop.f32.mrb[58].mxu0 }
 0x165   : > { %v1187_v5 = vadd.f32 %v4602_v3, %v5586_v61  ;;  %v1181_v6 = vpop.f32.mrb[59].mxu0 }
 0x166   : > { %4805 = vmatprep.mubr.msk.f32.mxu1 %vm1673_vm1, %v1586_v2  ;;  %v1182_v7 = vadd.f32 %v5586_v61, %v1181_v6 }
 0x167   : > { %4806 = vmatmul.mubr.msk.f32.gmra.mrb[56].mxu1 %vm1673_vm1, %v1587_v4  ;;  %v1589_v10 = vmax.f32 %v1187_v5, 0.0 }
 0x168   : > { %v1588_v8 = vmax.f32 %v1182_v7, 0.0  ;;  %v4605_v9 = vpop.f32.mrb[60].mxu0 }
 0x169   : > { %v1197_v11 = vadd.f32 %v4605_v9, %v5586_v61  ;;  %v1191_v12 = vpop.f32.mrb[61].mxu0 }
 0x16a   : > { %4808 = vmatprep.mubr.msk.f32.mxu1 %vm1673_vm1, %v1588_v8  ;;  %v1192_v13 = vadd.f32 %v5586_v61, %v1191_v12 }
 0x16b   : > { %4809 = vmatmul.mubr.msk.f32.gmra.mrb[58].mxu1 %vm1673_vm1, %v1589_v10  ;;  %v1591_v16 = vmax.f32 %v1197_v11, 0.0 }
 0x16c   : > { %v1590_v14 = vmax.f32 %v1192_v13, 0.0  ;;  %v4608_v15 = vpop.f32.mrb[62].mxu0 }
 0x16d   : > { %v1207_v17 = vadd.f32 %v4608_v15, %v5586_v61  ;;  %v1201_v18 = vpop.f32.mrb[63].mxu0 }
 0x16e   : > { %4811 = vmatprep.mubr.msk.f32.mxu1 %vm1673_vm1, %v1590_v14  ;;  %v1202_v19 = vadd.f32 %v5586_v61, %v1201_v18 }
 0x16f   : > { %4812 = vmatmul.mubr.msk.f32.gmra.mrb[60].mxu1 %vm1673_vm1, %v1591_v16  ;;  %v1593_v22 = vmax.f32 %v1207_v17, 0.0 }
 0x170   : > { %v1592_v20 = vmax.f32 %v1202_v19, 0.0  ;;  %v4611_v21 = vpop.f32.mrb[64].mxu0 }
 0x171   : > { %v1217_v23 = vadd.f32 %v4611_v21, %v5586_v61  ;;  %v1211_v24 = vpop.f32.mrb[65].mxu0 }
 0x172   : > { %4814 = vmatprep.mubr.msk.f32.mxu1 %vm1673_vm1, %v1592_v20  ;;  %v1212_v25 = vadd.f32 %v5586_v61, %v1211_v24 }
 0x173   : > { %4815 = vmatmul.mubr.msk.f32.gmra.mrb[62].mxu1 %vm1673_vm1, %v1593_v22  ;;  %v1595_v28 = vmax.f32 %v1217_v23, 0.0 }
 0x174   : > { %v1594_v26 = vmax.f32 %v1212_v25, 0.0  ;;  %v4614_v27 = vpop.f32.mrb[66].mxu0 }
 0x175   : > { %v1227_v29 = vadd.f32 %v4614_v27, %v5586_v61  ;;  %v1221_v30 = vpop.f32.mrb[67].mxu0 }
 0x176   : > { %v1222_v31 = vadd.f32 %v5586_v61, %v1221_v30  ;;  %4817 = vmatprep.mubr.msk.f32.mxu1 %vm1673_vm1, %v1594_v26 }
 0x177   : > { %4818 = vmatmul.mubr.msk.f32.gmra.mrb[64].mxu1 %vm1673_vm1, %v1595_v28  ;;  %v1597_v34 = vmax.f32 %v1227_v29, 0.0 }
 0x178   : > { %v1596_v32 = vmax.f32 %v1222_v31, 0.0  ;;  %v4617_v33 = vpop.f32.mrb[68].mxu0 }
 0x179   : > { %v1237_v35 = vadd.f32 %v4617_v33, %v5586_v61  ;;  %v1231_v36 = vpop.f32.mrb[69].mxu0 }
 0x17a   : > { %v1232_v37 = vadd.f32 %v5586_v61, %v1231_v36  ;;  %4820 = vmatprep.mubr.msk.f32.mxu1 %vm1673_vm1, %v1596_v32 }
 0x17b   : > { %4821 = vmatmul.mubr.msk.f32.gmra.mrb[66].mxu1 %vm1673_vm1, %v1597_v34  ;;  %v1599_v40 = vmax.f32 %v1237_v35, 0.0 }
 0x17c   : > { %v1598_v38 = vmax.f32 %v1232_v37, 0.0  ;;  %v4620_v39 = vpop.f32.mrb[70].mxu0 }
 0x17d   : > { %v1247_v41 = vadd.f32 %v4620_v39, %v5586_v61  ;;  %v1241_v42 = vpop.f32.mrb[71].mxu0 }
 0x17e   : > { %v1242_v43 = vadd.f32 %v5586_v61, %v1241_v42  ;;  %4823 = vmatprep.mubr.msk.f32.mxu1 %vm1673_vm1, %v1598_v38 }
 0x17f   : > { %4824 = vmatmul.mubr.msk.f32.gmra.mrb[68].mxu1 %vm1673_vm1, %v1599_v40  ;;  %v1601_v46 = vmax.f32 %v1247_v41, 0.0 }
 0x180   : > { %v1600_v44 = vmax.f32 %v1242_v43, 0.0  ;;  %v4623_v45 = vpop.f32.mrb[72].mxu0 }
 0x181   : > { %v1257_v47 = vadd.f32 %v4623_v45, %v5586_v61  ;;  %v1251_v48 = vpop.f32.mrb[73].mxu0 }
 0x182   : > { %v1252_v49 = vadd.f32 %v5586_v61, %v1251_v48  ;;  %4826 = vmatprep.mubr.msk.f32.mxu1 %vm1673_vm1, %v1600_v44 }
 0x183   : > { %4827 = vmatmul.mubr.msk.f32.gmra.mrb[70].mxu1 %vm1673_vm1, %v1601_v46  ;;  %v1603_v52 = vmax.f32 %v1257_v47, 0.0 }
 0x184   : > { %v1602_v50 = vmax.f32 %v1252_v49, 0.0  ;;  %v4626_v51 = vpop.f32.mrb[74].mxu0 }
 0x185   : > { %v1267_v53 = vadd.f32 %v4626_v51, %v5586_v61  ;;  %v1261_v54 = vpop.f32.mrb[75].mxu0 }
 0x186   : > { %v1262_v55 = vadd.f32 %v5586_v61, %v1261_v54  ;;  %4829 = vmatprep.mubr.msk.f32.mxu1 %vm1673_vm1, %v1602_v50 }
 0x187   : > { %4830 = vmatmul.mubr.msk.f32.gmra.mrb[72].mxu1 %vm1673_vm1, %v1603_v52  ;;  %v1605_v58 = vmax.f32 %v1267_v53, 0.0 }
 0x188   : > { %v1604_v56 = vmax.f32 %v1262_v55, 0.0  ;;  %v4629_v57 = vpop.f32.mrb[76].mxu0 }
 0x189   : > { %v1277_v59 = vadd.f32 %v4629_v57, %v5586_v61  ;;  %v1271_v60 = vpop.f32.mrb[77].mxu0 }
 0x18a   : > { %v1272_v62 = vadd.f32 %v5586_v61, %v1271_v60  ;;  %4832 = vmatprep.mubr.msk.f32.mxu1 %vm1673_vm1, %v1604_v56 }
 0x18b   : > { %4833 = vmatmul.mubr.msk.f32.gmra.mrb[74].mxu1 %vm1673_vm1, %v1605_v58  ;;  %v1607_v1 = vmax.f32 %v1277_v59, 0.0 }
 0x18c   : > { %v1606_v63 = vmax.f32 %v1272_v62, 0.0  ;;  %v4632_v0 = vpop.f32.mrb[78].mxu0 }
 0x18d   : > { %v1287_v2 = vadd.f32 %v4632_v0, %v5586_v61  ;;  %v1281_v3 = vpop.f32.mrb[79].mxu0 }
 0x18e   : > { %v1282_v4 = vadd.f32 %v5586_v61, %v1281_v3  ;;  %4835 = vmatprep.mubr.msk.f32.mxu1 %vm1673_vm1, %v1606_v63 }
 0x18f   : > { %4836 = vmatmul.mubr.msk.f32.gmra.mrb[76].mxu1 %vm1673_vm1, %v1607_v1  ;;  %v1609_v7 = vmax.f32 %v1287_v2, 0.0 }
 0x190   : > { %v1608_v5 = vmax.f32 %v1282_v4, 0.0  ;;  %v4635_v6 = vpop.f32.mrb[80].mxu0 }
 0x191   : > { %v1297_v8 = vadd.f32 %v4635_v6, %v5586_v61  ;;  %v1291_v9 = vpop.f32.mrb[81].mxu0 }
 0x192   : > { %v1292_v10 = vadd.f32 %v5586_v61, %v1291_v9  ;;  %4838 = vmatprep.mubr.msk.f32.mxu1 %vm1673_vm1, %v1608_v5 }
 0x193   : > { %4839 = vmatmul.mubr.msk.f32.gmra.mrb[78].mxu1 %vm1673_vm1, %v1609_v7  ;;  %v1611_v13 = vmax.f32 %v1297_v8, 0.0 }
 0x194   : > { %v1610_v11 = vmax.f32 %v1292_v10, 0.0  ;;  %v4638_v12 = vpop.f32.mrb[82].mxu0 }
 0x195   : > { %v1307_v14 = vadd.f32 %v4638_v12, %v5586_v61  ;;  %v1301_v15 = vpop.f32.mrb[83].mxu0 }
 0x196   : > { %v1302_v16 = vadd.f32 %v5586_v61, %v1301_v15  ;;  %4841 = vmatprep.mubr.msk.f32.mxu1 %vm1673_vm1, %v1610_v11 }
 0x197   : > { %4842 = vmatmul.mubr.msk.f32.gmra.mrb[80].mxu1 %vm1673_vm1, %v1611_v13  ;;  %v1613_v19 = vmax.f32 %v1307_v14, 0.0 }
 0x198   : > { %v1612_v17 = vmax.f32 %v1302_v16, 0.0  ;;  %v4641_v18 = vpop.f32.mrb[84].mxu0 }
 0x199   : > { %v1317_v20 = vadd.f32 %v4641_v18, %v5586_v61  ;;  %v1311_v21 = vpop.f32.mrb[85].mxu0 }
 0x19a   : > { %v1312_v22 = vadd.f32 %v5586_v61, %v1311_v21  ;;  %4844 = vmatprep.mubr.msk.f32.mxu1 %vm1673_vm1, %v1612_v17 }
 0x19b   : > { %4845 = vmatmul.mubr.msk.f32.gmra.mrb[82].mxu1 %vm1673_vm1, %v1613_v19  ;;  %v1615_v25 = vmax.f32 %v1317_v20, 0.0 }
 0x19c   : > { %v1614_v23 = vmax.f32 %v1312_v22, 0.0  ;;  %v4644_v24 = vpop.f32.mrb[86].mxu0 }
 0x19d   : > { %v1327_v26 = vadd.f32 %v4644_v24, %v5586_v61  ;;  %v1321_v27 = vpop.f32.mrb[87].mxu0 }
 0x19e   : > { %v1322_v28 = vadd.f32 %v5586_v61, %v1321_v27  ;;  %4847 = vmatprep.mubr.msk.f32.mxu1 %vm1673_vm1, %v1614_v23 }
 0x19f   : > { %4848 = vmatmul.mubr.msk.f32.gmra.mrb[84].mxu1 %vm1673_vm1, %v1615_v25  ;;  %v1617_v31 = vmax.f32 %v1327_v26, 0.0  ;;  %v5848_v26 = vld [vmem:[%s6332_s4] ss:$0 sm:$0xff] }
 0x1a0   : > { %v1616_v29 = vmax.f32 %v1322_v28, 0.0  ;;  %v4647_v30 = vpop.f32.mrb[88].mxu0 }
 0x1a1   : > { %v1337_v32 = vadd.f32 %v4647_v30, %v5586_v61  ;;  %v1331_v33 = vpop.f32.mrb[89].mxu0 }
 0x1a2   : > { %v1332_v34 = vadd.f32 %v5586_v61, %v1331_v33  ;;  %4850 = vmatprep.mubr.msk.f32.mxu1 %vm1673_vm1, %v1616_v29 }
 0x1a3   : > { %4851 = vmatmul.mubr.msk.f32.gmra.mrb[86].mxu1 %vm1673_vm1, %v1617_v31  ;;  %v1619_v37 = vmax.f32 %v1337_v32, 0.0 }
 0x1a4   : > { %v1618_v35 = vmax.f32 %v1332_v34, 0.0  ;;  %v4650_v36 = vpop.f32.mrb[90].mxu0 }
 0x1a5   : > { %v1347_v38 = vadd.f32 %v4650_v36, %v5586_v61  ;;  %v1341_v39 = vpop.f32.mrb[91].mxu0 }
 0x1a6   : > { %v1342_v40 = vadd.f32 %v5586_v61, %v1341_v39  ;;  %4853 = vmatprep.mubr.msk.f32.mxu1 %vm1673_vm1, %v1618_v35 }
 0x1a7   : > { %4854 = vmatmul.mubr.msk.f32.gmra.mrb[88].mxu1 %vm1673_vm1, %v1619_v37  ;;  %v1621_v43 = vmax.f32 %v1347_v38, 0.0 }
 0x1a8   : > { %v1620_v41 = vmax.f32 %v1342_v40, 0.0  ;;  %v4653_v42 = vpop.f32.mrb[92].mxu0 }
 0x1a9   : > { %v1357_v44 = vadd.f32 %v4653_v42, %v5586_v61  ;;  %v1351_v45 = vpop.f32.mrb[93].mxu0 }
 0x1aa   : > { %v1352_v46 = vadd.f32 %v5586_v61, %v1351_v45  ;;  %4856 = vmatprep.mubr.msk.f32.mxu1 %vm1673_vm1, %v1620_v41 }
 0x1ab   : > { %4857 = vmatmul.mubr.msk.f32.gmra.mrb[90].mxu1 %vm1673_vm1, %v1621_v43  ;;  %v1623_v49 = vmax.f32 %v1357_v44, 0.0 }
 0x1ac   : > { %v1622_v47 = vmax.f32 %v1352_v46, 0.0  ;;  %v4656_v48 = vpop.f32.mrb[94].mxu0 }
 0x1ad   : > { %v1367_v50 = vadd.f32 %v4656_v48, %v5586_v61  ;;  %v1361_v51 = vpop.f32.mrb[95].mxu0 }
 0x1ae   : > { %v1362_v52 = vadd.f32 %v5586_v61, %v1361_v51  ;;  %4859 = vmatprep.mubr.msk.f32.mxu1 %vm1673_vm1, %v1622_v47 }
 0x1af   : > { %4860 = vmatmul.mubr.msk.f32.gmra.mrb[92].mxu1 %vm1673_vm1, %v1623_v49  ;;  %v1625_v55 = vmax.f32 %v1367_v50, 0.0 }
 0x1b0   : > { %v1624_v53 = vmax.f32 %v1362_v52, 0.0  ;;  %v4659_v54 = vpop.f32.mrb[96].mxu0 }
 0x1b1   : > { %v1377_v56 = vadd.f32 %v4659_v54, %v5586_v61  ;;  %v1371_v57 = vpop.f32.mrb[97].mxu0 }
 0x1b2   : > { %v1372_v58 = vadd.f32 %v5586_v61, %v1371_v57  ;;  %4862 = vmatprep.mubr.msk.f32.mxu1 %vm1673_vm1, %v1624_v53 }
 0x1b3   : > { %4863 = vmatmul.mubr.msk.f32.gmra.mrb[94].mxu1 %vm1673_vm1, %v1625_v55  ;;  %v1627_v62 = vmax.f32 %v1377_v56, 0.0 }
 0x1b4   : > { %v1626_v59 = vmax.f32 %v1372_v58, 0.0  ;;  %v4662_v60 = vpop.f32.mrb[98].mxu0 }
 0x1b5   : > { %v1387_v63 = vadd.f32 %v4662_v60, %v5586_v61  ;;  %v1381_v0 = vpop.f32.mrb[99].mxu0 }
 0x1b6   : > { %v1382_v1 = vadd.f32 %v5586_v61, %v1381_v0  ;;  %4865 = vmatprep.mubr.msk.f32.mxu1 %vm1673_vm1, %v1626_v59 }
 0x1b7   : > { %4866 = vmatmul.mubr.msk.f32.gmra.mrb[96].mxu1 %vm1673_vm1, %v1627_v62  ;;  %v1629_v4 = vmax.f32 %v1387_v63, 0.0 }
 0x1b8   : > { %v1628_v2 = vmax.f32 %v1382_v1, 0.0  ;;  %v4665_v3 = vpop.f32.mrb[100].mxu0 }
 0x1b9   : > { %v1397_v5 = vadd.f32 %v4665_v3, %v5586_v61  ;;  %v1391_v6 = vpop.f32.mrb[101].mxu0 }
 0x1ba   : > { %v1392_v7 = vadd.f32 %v5586_v61, %v1391_v6  ;;  %4868 = vmatprep.mubr.msk.f32.mxu1 %vm1673_vm1, %v1628_v2 }
 0x1bb   : > { %4869 = vmatmul.mubr.msk.f32.gmra.mrb[98].mxu1 %vm1673_vm1, %v1629_v4  ;;  %v1631_v10 = vmax.f32 %v1397_v5, 0.0  ;;  %v5875_v4 = vld [vmem:[%s6330_s2] ss:$0 sm:$0xff] }
 0x1bc   : > { %v1630_v8 = vmax.f32 %v1392_v7, 0.0  ;;  %v4668_v9 = vpop.f32.mrb[102].mxu0 }
 0x1bd   : > { %v1407_v11 = vadd.f32 %v4668_v9, %v5586_v61  ;;  %v1401_v12 = vpop.f32.mrb[103].mxu0 }
 0x1be   : > { %v1402_v13 = vadd.f32 %v5586_v61, %v1401_v12  ;;  %4871 = vmatprep.mubr.msk.f32.mxu1 %vm1673_vm1, %v1630_v8 }
 0x1bf   : > { %4872 = vmatmul.mubr.msk.f32.gmra.mrb[100].mxu1 %vm1673_vm1, %v1631_v10  ;;  %v1633_v16 = vmax.f32 %v1407_v11, 0.0 }
 0x1c0   : > { %v1632_v14 = vmax.f32 %v1402_v13, 0.0  ;;  %v4671_v15 = vpop.f32.mrb[104].mxu0 }
 0x1c1   : > { %v1417_v17 = vadd.f32 %v4671_v15, %v5586_v61  ;;  %v1411_v18 = vpop.f32.mrb[105].mxu0 }
 0x1c2   : > { %v1412_v19 = vadd.f32 %v5586_v61, %v1411_v18  ;;  %4874 = vmatprep.mubr.msk.f32.mxu1 %vm1673_vm1, %v1632_v14 }
 0x1c3   : > { %4875 = vmatmul.mubr.msk.f32.gmra.mrb[102].mxu1 %vm1673_vm1, %v1633_v16  ;;  %v1635_v22 = vmax.f32 %v1417_v17, 0.0 }
 0x1c4   : > { %v1634_v20 = vmax.f32 %v1412_v19, 0.0  ;;  %v4674_v21 = vpop.f32.mrb[106].mxu0 }
 0x1c5   : > { %v1427_v23 = vadd.f32 %v4674_v21, %v5586_v61  ;;  %v1421_v24 = vpop.f32.mrb[107].mxu0 }
 0x1c6   : > { %v1422_v25 = vadd.f32 %v5586_v61, %v1421_v24  ;;  %4877 = vmatprep.mubr.msk.f32.mxu1 %vm1673_vm1, %v1634_v20 }
 0x1c7   : > { %4878 = vmatmul.mubr.msk.f32.gmra.mrb[104].mxu1 %vm1673_vm1, %v1635_v22  ;;  %v1637_v29 = vmax.f32 %v1427_v23, 0.0 }
 0x1c8   : > { %v1636_v27 = vmax.f32 %v1422_v25, 0.0  ;;  %v4677_v28 = vpop.f32.mrb[108].mxu0 }
 0x1c9   : > { %v1437_v30 = vadd.f32 %v4677_v28, %v5586_v61  ;;  %v1431_v31 = vpop.f32.mrb[109].mxu0 }
 0x1ca   : > { %v4723_v32 = vpop.f32.mrb[0].mxu1  ;;  %v1432_v33 = vadd.f32 %v5586_v61, %v1431_v31  ;;  %4880 = vmatprep.mubr.msk.f32.mxu1 %vm1673_vm1, %v1636_v27 }
 0x1cb   : > { %v2130_v34 = vadd.f32 %v4723_v32, %v5848_v26  ;;  %v2124_v35 = vpop.f32.mrb[1].mxu1  ;;  %4881 = vmatmul.mubr.msk.f32.gmra.mrb[106].mxu1 %vm1673_vm1, %v1637_v29  ;;  %v1639_v40 = vmax.f32 %v1437_v30, 0.0 }
 0x1cc   : > { %v2125_v36 = vadd.f32 %v5848_v26, %v2124_v35  ;;  %v1638_v37 = vmax.f32 %v1432_v33, 0.0  ;;  %v4680_v38 = vpop.f32.mrb[110].mxu0 }
 0x1cd   : > { %v2764_v39 = vmax.f32 %v2130_v34, 0.0  ;;  %v1447_v41 = vadd.f32 %v4680_v38, %v5586_v61  ;;  %v1441_v42 = vpop.f32.mrb[111].mxu0 }
 0x1ce   : > { %v2763_v43 = vmax.f32 %v2125_v36, 0.0  ;;  %v4726_v44 = vpop.f32.mrb[2].mxu1  ;;  %v1442_v45 = vadd.f32 %v5586_v61, %v1441_v42  ;;  %4883 = vmatprep.mubr.msk.f32.mxu1 %vm1673_vm1, %v1638_v37 }
 0x1cf   : > { %v2140_v46 = vadd.f32 %v4726_v44, %v5848_v26  ;;  %v2134_v47 = vpop.f32.mrb[3].mxu1  ;;  %4884 = vmatmul.mubr.msk.f32.gmra.mrb[108].mxu1 %vm1673_vm1, %v1639_v40  ;;  %v1641_v53 = vmax.f32 %v1447_v41, 0.0 }
 0x1d0   : > { %v5861_v48 = vpack.c.bf16 %v2764_v39, %v2763_v43  ;;  %v2135_v49 = vadd.f32 %v5848_v26, %v2134_v47  ;;  %v1640_v50 = vmax.f32 %v1442_v45, 0.0  ;;  %v4683_v51 = vpop.f32.mrb[112].mxu0 }
 0x1d1   : > { %v2766_v52 = vmax.f32 %v2140_v46, 0.0  ;;  %v1457_v54 = vadd.f32 %v4683_v51, %v5586_v61  ;;  %v1451_v55 = vpop.f32.mrb[113].mxu0 }
 0x1d2   : > { %v2765_v56 = vmax.f32 %v2135_v49, 0.0  ;;  %v4729_v57 = vpop.f32.mrb[4].mxu1  ;;  %v1452_v58 = vadd.f32 %v5586_v61, %v1451_v55  ;;  %4886 = vmatprep.mubr.msk.f32.mxu1 %vm1673_vm1, %v1640_v50 }
 0x1d3   : > { %v2150_v59 = vadd.f32 %v4729_v57, %v5848_v26  ;;  %v2144_v60 = vpop.f32.mrb[5].mxu1  ;;  %4887 = vmatmul.mubr.msk.f32.gmra.mrb[110].mxu1 %vm1673_vm1, %v1641_v53  ;;  %v1643_v3 = vmax.f32 %v1457_v54, 0.0 }
 0x1d4   : > { %v5869_v62 = vpack.c.bf16 %v2766_v52, %v2765_v56  ;;  %v2145_v63 = vadd.f32 %v5848_v26, %v2144_v60  ;;  %v1642_v0 = vmax.f32 %v1452_v58, 0.0  ;;  %v4686_v1 = vpop.f32.mrb[114].mxu0 }
 0x1d5   : > { %v2768_v2 = vmax.f32 %v2150_v59, 0.0  ;;  %v1467_v61 = vadd.f32 %v5875_v4, %v4686_v1  ;;  %v1461_v5 = vpop.f32.mrb[115].mxu0 }
 0x1d6   : > { %v2767_v6 = vmax.f32 %v2145_v63, 0.0  ;;  %v4732_v7 = vpop.f32.mrb[6].mxu1  ;;  %4889 = vmatprep.mubr.msk.f32.mxu1 %vm1673_vm1, %v1642_v0  ;;  %v1462_v8 = vadd.f32 %v5875_v4, %v1461_v5 }
 0x1d7   : > { %v2160_v9 = vadd.f32 %v4732_v7, %v5848_v26  ;;  %v2154_v10 = vpop.f32.mrb[7].mxu1  ;;  %4890 = vmatmul.mubr.msk.f32.gmra.mrb[112].mxu1 %vm1673_vm1, %v1643_v3  ;;  %v1645_v11 = vmax.f32 %v1467_v61, 0.0 }
 0x1d8   : > { %v5882_v12 = vpack.c.bf16 %v2768_v2, %v2767_v6  ;;  %v2155_v13 = vadd.f32 %v5848_v26, %v2154_v10  ;;  %v1644_v14 = vmax.f32 %v1462_v8, 0.0  ;;  %v4689_v15 = vpop.f32.mrb[116].mxu0 }
 0x1d9   : > { %v2770_v16 = vmax.f32 %v2160_v9, 0.0  ;;  %v1477_v17 = vadd.f32 %v5875_v4, %v4689_v15  ;;  %v1471_v18 = vpop.f32.mrb[117].mxu0 }
 0x1da   : > { %v2769_v19 = vmax.f32 %v2155_v13, 0.0  ;;  %v4735_v20 = vpop.f32.mrb[8].mxu1  ;;  %4892 = vmatprep.mubr.msk.f32.mxu1 %vm1673_vm1, %v1644_v14  ;;  %v1472_v21 = vadd.f32 %v5875_v4, %v1471_v18 }
 0x1db   : > { %v2170_v22 = vadd.f32 %v4735_v20, %v5848_v26  ;;  %v2164_v23 = vpop.f32.mrb[9].mxu1  ;;  %4893 = vmatmul.mubr.msk.f32.gmra.mrb[114].mxu1 %vm1673_vm1, %v1645_v11  ;;  %v1647_v24 = vmax.f32 %v1477_v17, 0.0 }
 0x1dc   : > { %v5890_v25 = vpack.c.bf16 %v2770_v16, %v2769_v19  ;;  %v2165_v27 = vadd.f32 %v5848_v26, %v2164_v23  ;;  %v1646_v28 = vmax.f32 %v1472_v21, 0.0  ;;  %v4692_v29 = vpop.f32.mrb[118].mxu0 }
 0x1dd   : > { %v2772_v30 = vmax.f32 %v2170_v22, 0.0  ;;  %v1487_v31 = vadd.f32 %v5875_v4, %v4692_v29  ;;  %v1481_v32 = vpop.f32.mrb[119].mxu0 }
 0x1de   : > { %v2771_v33 = vmax.f32 %v2165_v27, 0.0  ;;  %v4738_v34 = vpop.f32.mrb[10].mxu1  ;;  %4895 = vmatprep.mubr.msk.f32.mxu1 %vm1673_vm1, %v1646_v28  ;;  %v1482_v35 = vadd.f32 %v5875_v4, %v1481_v32 }
 0x1df   : > { %v2180_v36 = vadd.f32 %v4738_v34, %v5848_v26  ;;  %v2174_v37 = vpop.f32.mrb[11].mxu1  ;;  %4896 = vmatmul.mubr.msk.f32.gmra.mrb[116].mxu1 %vm1673_vm1, %v1647_v24  ;;  %v1649_v38 = vmax.f32 %v1487_v31, 0.0 }
 0x1e0   : > { %v5898_v39 = vpack.c.bf16 %v2772_v30, %v2771_v33  ;;  %v2175_v40 = vadd.f32 %v5848_v26, %v2174_v37  ;;  %v1648_v41 = vmax.f32 %v1482_v35, 0.0  ;;  %v4695_v42 = vpop.f32.mrb[120].mxu0 }
 0x1e1   : > { %v2774_v43 = vmax.f32 %v2180_v36, 0.0  ;;  %v1497_v44 = vadd.f32 %v5875_v4, %v4695_v42  ;;  %v1491_v45 = vpop.f32.mrb[121].mxu0 }
 0x1e2   : > { %v2773_v46 = vmax.f32 %v2175_v40, 0.0  ;;  %v4741_v47 = vpop.f32.mrb[12].mxu1  ;;  %4898 = vmatprep.mubr.msk.f32.mxu1 %vm1673_vm1, %v1648_v41  ;;  %v1492_v49 = vadd.f32 %v5875_v4, %v1491_v45 }
 0x1e3   : > { %v2190_v50 = vadd.f32 %v4741_v47, %v5848_v26  ;;  %v2184_v51 = vpop.f32.mrb[13].mxu1  ;;  %4899 = vmatmul.mubr.msk.f32.gmra.mrb[118].mxu1 %vm1673_vm1, %v1649_v38  ;;  %v1651_v52 = vmax.f32 %v1497_v44, 0.0 }
 0x1e4   : > { %v5906_v53 = vpack.c.bf16 %v2774_v43, %v2773_v46  ;;  %v2185_v54 = vadd.f32 %v5848_v26, %v2184_v51  ;;  %v1650_v55 = vmax.f32 %v1492_v49, 0.0  ;;  %v4698_v56 = vpop.f32.mrb[122].mxu0 }
 0x1e5   : > { %v2776_v57 = vmax.f32 %v2190_v50, 0.0  ;;  %v1507_v58 = vadd.f32 %v5875_v4, %v4698_v56  ;;  %v1501_v59 = vpop.f32.mrb[123].mxu0 }
 0x1e6   : > { %v2775_v60 = vmax.f32 %v2185_v54, 0.0  ;;  %v4744_v63 = vpop.f32.mrb[14].mxu1  ;;  %4901 = vmatprep.mubr.msk.f32.mxu1 %vm1673_vm1, %v1650_v55  ;;  %v1502_v0 = vadd.f32 %v5875_v4, %v1501_v59 }
 0x1e7   : > { %v2200_v1 = vadd.f32 %v4744_v63, %v5848_v26  ;;  %v2194_v2 = vpop.f32.mrb[15].mxu1  ;;  %4902 = vmatmul.mubr.msk.f32.gmra.mrb[120].mxu1 %vm1673_vm1, %v1651_v52  ;;  %v1653_v3 = vmax.f32 %v1507_v58, 0.0 }
 0x1e8   : > { %v5914_v61 = vpack.c.bf16 %v2776_v57, %v2775_v60  ;;  %v2195_v5 = vadd.f32 %v5848_v26, %v2194_v2  ;;  %v1652_v6 = vmax.f32 %v1502_v0, 0.0  ;;  %v4701_v7 = vpop.f32.mrb[124].mxu0 }
 0x1e9   : > { %v2778_v8 = vmax.f32 %v2200_v1, 0.0  ;;  %v1517_v9 = vadd.f32 %v5875_v4, %v4701_v7  ;;  %v1511_v10 = vpop.f32.mrb[125].mxu0 }
 0x1ea   : > { %v2777_v11 = vmax.f32 %v2195_v5, 0.0  ;;  %v4747_v13 = vpop.f32.mrb[16].mxu1  ;;  %4904 = vmatprep.mubr.msk.f32.mxu1 %vm1673_vm1, %v1652_v6  ;;  %v1512_v14 = vadd.f32 %v5875_v4, %v1511_v10 }
 0x1eb   : > { %v2210_v15 = vadd.f32 %v4747_v13, %v5848_v26  ;;  %v2204_v16 = vpop.f32.mrb[17].mxu1  ;;  %4905 = vmatmul.mubr.msk.f32.gmra.mrb[122].mxu1 %vm1673_vm1, %v1653_v3  ;;  %v1655_v17 = vmax.f32 %v1517_v9, 0.0 }
 0x1ec   : > { %v5922_v18 = vpack.c.bf16 %v2778_v8, %v2777_v11  ;;  %v2205_v19 = vadd.f32 %v5848_v26, %v2204_v16  ;;  %v1654_v20 = vmax.f32 %v1512_v14, 0.0  ;;  %v4704_v21 = vpop.f32.mrb[126].mxu0 }
 0x1ed   : > { %v2780_v22 = vmax.f32 %v2210_v15, 0.0  ;;  %v1527_v23 = vadd.f32 %v5875_v4, %v4704_v21  ;;  %v1521_v24 = vpop.f32.mrb[127].mxu0 }
 0x1ee   : > { %v2779_v27 = vmax.f32 %v2205_v19, 0.0  ;;  %v4750_v28 = vpop.f32.mrb[18].mxu1  ;;  %4907 = vmatprep.mubr.msk.f32.mxu1 %vm1673_vm1, %v1654_v20  ;;  %v1522_v29 = vadd.f32 %v5875_v4, %v1521_v24  ;;  %v5940_v4 = vld [vmem:[%s6333_s5] sm:$0x1] }
 0x1ef   : > { %v2220_v30 = vadd.f32 %v4750_v28, %v5848_v26  ;;  %v2214_v31 = vpop.f32.mrb[19].mxu1  ;;  %4908 = vmatmul.mubr.msk.f32.gmra.mrb[124].mxu1 %vm1673_vm1, %v1655_v17  ;;  %v1657_v33 = vmax.f32 %v1527_v23, 0.0  ;;  %4401 = vmatprep.mubr.msk.f32.mxu0 %vm1673_vm1, %v5940_v4 }
 0x1f0   : > { %v4937_v34 = vpack.c.bf16 %v2780_v22, %v2779_v27  ;;  %v2215_v35 = vadd.f32 %v5848_v26, %v2214_v31  ;;  %v1656_v36 = vmax.f32 %v1522_v29, 0.0 }
 0x1f1   : > { %v2782_v37 = vmax.f32 %v2220_v30, 0.0 }
 0x1f2   : > { %v2781_v38 = vmax.f32 %v2215_v35, 0.0  ;;  %v4753_v40 = vpop.f32.mrb[20].mxu1  ;;  %4939 = vmatprep.subr.msk.bf16.mxu0 %vm5931_vm2, %v4937_v34  ;;  %4910 = vmatprep.mubr.msk.f32.mxu1 %vm1673_vm1, %v1656_v36 }
 0x1f3   : > { %v2230_v41 = vadd.f32 %v4753_v40, %v5848_v26  ;;  %v2224_v42 = vpop.f32.mrb[21].mxu1  ;;  %4942 = vmatpush3.bf16.xpose.msk.msra.mxu0 %vm5931_vm2, %v5861_v48  ;;  %4911 = vmatmul.mubr.msk.f32.gmra.mrb[126].mxu1 %vm1673_vm1, %v1657_v33 }
 0x1f4   : > { %v4943_v43 = vpack.c.bf16 %v2782_v37, %v2781_v38  ;;  %v2225_v44 = vadd.f32 %v5848_v26, %v2224_v42  ;;  %4435 = vmatprep.mubr.msk.f32.mxu1 %vm1673_vm1, %v5940_v4 }
 0x1f5   : > { %v2784_v45 = vmax.f32 %v2230_v41, 0.0 }
 0x1f6   : > { %v2783_v46 = vmax.f32 %v2225_v44, 0.0  ;;  %v4756_v47 = vpop.f32.mrb[22].mxu1  ;;  %4945 = vmatprep.subr.msk.bf16.mxu0 %vm5931_vm2, %v4943_v43 }
 0x1f7   : > { %v2240_v49 = vadd.f32 %v4756_v47, %v5848_v26  ;;  %v2234_v48 = vpop.f32.mrb[23].mxu1 }
 0x1f8   : > { %v4949_v50 = vpack.c.bf16 %v2784_v45, %v2783_v46  ;;  %v2235_v51 = vadd.f32 %v5848_v26, %v2234_v48 }
 0x1f9   : > { %v2786_v52 = vmax.f32 %v2240_v49, 0.0 }
 0x1fa   : > { %v2785_v54 = vmax.f32 %v2235_v51, 0.0  ;;  %v4759_v55 = vpop.f32.mrb[24].mxu1 }
 0x1fb   : > { %v2250_v56 = vadd.f32 %v4759_v55, %v5848_v26  ;;  %v2244_v57 = vpop.f32.mrb[25].mxu1  ;;  %4948 = vmatpush3.bf16.xpose.msk.msra.mxu0 %vm5931_vm2, %v5869_v62 }
 0x1fc   : > { %v4955_v58 = vpack.c.bf16 %v2786_v52, %v2785_v54  ;;  %v2245_v59 = vadd.f32 %v5848_v26, %v2244_v57  ;;  %4951 = vmatprep.subr.msk.bf16.mxu0 %vm5931_vm2, %v4949_v50 }
 0x1fd   : > { %v2788_v60 = vmax.f32 %v2250_v56, 0.0 }
 0x1fe   : > { %v2787_v63 = vmax.f32 %v2245_v59, 0.0  ;;  %v4762_v0 = vpop.f32.mrb[26].mxu1 }
 0x1ff   : > { %v2260_v1 = vadd.f32 %v4762_v0, %v5848_v26  ;;  %v2254_v2 = vpop.f32.mrb[27].mxu1 }
 0x200   : > { %v4961_v3 = vpack.c.bf16 %v2788_v60, %v2787_v63  ;;  %v2255_v5 = vadd.f32 %v5848_v26, %v2254_v2 }
 0x201   : > { %v2790_v6 = vmax.f32 %v2260_v1, 0.0 }
 0x202   : > { %v2789_v7 = vmax.f32 %v2255_v5, 0.0  ;;  %v4765_v8 = vpop.f32.mrb[28].mxu1 }
 0x203   : > { %v2270_v62 = vadd.f32 %v4765_v8, %v5848_v26  ;;  %v2264_v9 = vpop.f32.mrb[29].mxu1  ;;  %4954 = vmatpush3.bf16.xpose.msk.msra.mxu0 %vm5931_vm2, %v5882_v12 }
 0x204   : > { %v4967_v10 = vpack.c.bf16 %v2790_v6, %v2789_v7  ;;  %v2265_v11 = vadd.f32 %v5848_v26, %v2264_v9  ;;  %4957 = vmatprep.subr.msk.bf16.mxu0 %vm5931_vm2, %v4955_v58 }
 0x205   : > { %v2792_v13 = vmax.f32 %v2270_v62, 0.0 }
 0x206   : > { %v2791_v14 = vmax.f32 %v2265_v11, 0.0  ;;  %v4768_v15 = vpop.f32.mrb[30].mxu1 }
 0x207   : > { %v2280_v16 = vadd.f32 %v4768_v15, %v5848_v26  ;;  %v2274_v17 = vpop.f32.mrb[31].mxu1 }
 0x208   : > { %v4973_v19 = vpack.c.bf16 %v2792_v13, %v2791_v14  ;;  %v2275_v20 = vadd.f32 %v5848_v26, %v2274_v17 }
 0x209   : > { %v2794_v21 = vmax.f32 %v2280_v16, 0.0 }
 0x20a   : > { %v2793_v22 = vmax.f32 %v2275_v20, 0.0  ;;  %v4771_v23 = vpop.f32.mrb[32].mxu1 }
 0x20b   : > { %v2290_v12 = vadd.f32 %v4771_v23, %v5848_v26  ;;  %v2284_v24 = vpop.f32.mrb[33].mxu1  ;;  %4960 = vmatpush3.bf16.xpose.msk.msra.mxu0 %vm5931_vm2, %v5890_v25 }
 0x20c   : > { %v4979_v27 = vpack.c.bf16 %v2794_v21, %v2793_v22  ;;  %v2285_v28 = vadd.f32 %v5848_v26, %v2284_v24  ;;  %4963 = vmatprep.subr.msk.bf16.mxu0 %vm5931_vm2, %v4961_v3 }
 0x20d   : > { %v2796_v29 = vmax.f32 %v2290_v12, 0.0 }
 0x20e   : > { %v2795_v30 = vmax.f32 %v2285_v28, 0.0  ;;  %v4774_v31 = vpop.f32.mrb[34].mxu1 }
 0x20f   : > { %v2300_v33 = vadd.f32 %v4774_v31, %v5848_v26  ;;  %v2294_v34 = vpop.f32.mrb[35].mxu1 }
 0x210   : > { %v5985_v35 = vpack.c.bf16 %v2796_v29, %v2795_v30  ;;  %v2295_v36 = vadd.f32 %v5848_v26, %v2294_v34 }
 0x211   : > { %v2798_v37 = vmax.f32 %v2300_v33, 0.0 }
 0x212   : > { %v2797_v38 = vmax.f32 %v2295_v36, 0.0  ;;  %v4777_v40 = vpop.f32.mrb[36].mxu1 }
 0x213   : > { %v2310_v25 = vadd.f32 %v4777_v40, %v5848_v26  ;;  %v2304_v41 = vpop.f32.mrb[37].mxu1  ;;  %4966 = vmatpush3.bf16.xpose.msk.msra.mxu0 %vm5931_vm2, %v5898_v39 }
 0x214   : > { %v5992_v42 = vpack.c.bf16 %v2798_v37, %v2797_v38  ;;  %v2305_v43 = vadd.f32 %v5848_v26, %v2304_v41  ;;  %4969 = vmatprep.subr.msk.bf16.mxu0 %vm5931_vm2, %v4967_v10 }
 0x215   : > { %v2800_v44 = vmax.f32 %v2310_v25, 0.0 }
 0x216   : > { %v2799_v45 = vmax.f32 %v2305_v43, 0.0  ;;  %v4780_v46 = vpop.f32.mrb[38].mxu1 }
 0x217   : > { %v2320_v47 = vadd.f32 %v4780_v46, %v5848_v26  ;;  %v2314_v49 = vpop.f32.mrb[39].mxu1 }
 0x218   : > { %v5998_v48 = vpack.c.bf16 %v2800_v44, %v2799_v45  ;;  %v2315_v50 = vadd.f32 %v5848_v26, %v2314_v49 }
 0x219   : > { %v2802_v51 = vmax.f32 %v2320_v47, 0.0 }
 0x21a   : > { %v2801_v52 = vmax.f32 %v2315_v50, 0.0  ;;  %v4783_v39 = vpop.f32.mrb[40].mxu1 }
 0x21b   : > { %v2330_v54 = vadd.f32 %v4783_v39, %v5848_v26  ;;  %v2324_v55 = vpop.f32.mrb[41].mxu1  ;;  %4972 = vmatpush3.bf16.xpose.msk.msra.mxu0 %vm5931_vm2, %v5906_v53 }
 0x21c   : > { %v6005_v56 = vpack.c.bf16 %v2802_v51, %v2801_v52  ;;  %v2325_v57 = vadd.f32 %v5848_v26, %v2324_v55  ;;  %4975 = vmatprep.subr.msk.bf16.mxu0 %vm5931_vm2, %v4973_v19 }
 0x21d   : > { %v2804_v58 = vmax.f32 %v2330_v54, 0.0 }
 0x21e   : > { %v2803_v59 = vmax.f32 %v2325_v57, 0.0  ;;  %v4786_v60 = vpop.f32.mrb[42].mxu1 }
 0x21f   : > { %v2340_v63 = vadd.f32 %v4786_v60, %v5848_v26  ;;  %v2334_v0 = vpop.f32.mrb[43].mxu1 }
 0x220   : > { %v6011_v1 = vpack.c.bf16 %v2804_v58, %v2803_v59  ;;  %v2335_v2 = vadd.f32 %v5848_v26, %v2334_v0 }
 0x221   : > { %v2806_v3 = vmax.f32 %v2340_v63, 0.0 }
 0x222   : > { %v2805_v5 = vmax.f32 %v2335_v2, 0.0  ;;  %v4789_v53 = vpop.f32.mrb[44].mxu1 }
 0x223   : > { %v2350_v6 = vadd.f32 %v4789_v53, %v5848_v26  ;;  %v2344_v7 = vpop.f32.mrb[45].mxu1  ;;  %4978 = vmatpush3.bf16.xpose.msk.msra.mxu0 %vm5931_vm2, %v5914_v61 }
 0x224   : > { %v6018_v8 = vpack.c.bf16 %v2806_v3, %v2805_v5  ;;  %v2345_v62 = vadd.f32 %v5848_v26, %v2344_v7  ;;  %4981 = vmatprep.subr.msk.bf16.mxu0 %vm5931_vm2, %v4979_v27 }
 0x225   : > { %v2808_v9 = vmax.f32 %v2350_v6, 0.0 }
 0x226   : > { %v2807_v10 = vmax.f32 %v2345_v62, 0.0  ;;  %v4792_v11 = vpop.f32.mrb[46].mxu1 }
 0x227   : > { %v2360_v13 = vadd.f32 %v4792_v11, %v5848_v26  ;;  %v2354_v14 = vpop.f32.mrb[47].mxu1 }
 0x228   : > { %v6024_v15 = vpack.c.bf16 %v2808_v9, %v2807_v10  ;;  %v2355_v16 = vadd.f32 %v5848_v26, %v2354_v14 }
 0x229   : > { %v2810_v17 = vmax.f32 %v2360_v13, 0.0 }
 0x22a   : > { %v2809_v19 = vmax.f32 %v2355_v16, 0.0  ;;  %v4795_v61 = vpop.f32.mrb[48].mxu1 }
 0x22b   : > { %v2370_v20 = vadd.f32 %v4795_v61, %v5848_v26  ;;  %v2364_v21 = vpop.f32.mrb[49].mxu1  ;;  %4984 = vmatpush3.bf16.xpose.msk.msra.mxu0 %vm5931_vm2, %v5922_v18 }
 0x22c   : > { %v6031_v22 = vpack.c.bf16 %v2810_v17, %v2809_v19  ;;  %v2365_v23 = vadd.f32 %v5848_v26, %v2364_v21 }
 0x22d   : > { %v2812_v12 = vmax.f32 %v2370_v20, 0.0 }
 0x22e   : > { %v2811_v24 = vmax.f32 %v2365_v23, 0.0  ;;  %v4798_v27 = vpop.f32.mrb[50].mxu1 }
 0x22f   : > { %v2380_v28 = vadd.f32 %v4798_v27, %v5848_v26  ;;  %v2374_v29 = vpop.f32.mrb[51].mxu1 }
 0x230   : > { %v4985_v30 = vpack.c.bf16 %v2812_v12, %v2811_v24  ;;  %v2375_v31 = vadd.f32 %v5848_v26, %v2374_v29 }
 0x231   : > { %v2814_v33 = vmax.f32 %v2380_v28, 0.0 }
 0x232   : > { %4987 = vmatprep.subr.msk.bf16.mxu1 %vm5931_vm2, %v4985_v30  ;;  %v2813_v34 = vmax.f32 %v2375_v31, 0.0  ;;  %v4801_v36 = vpop.f32.mrb[52].mxu1  ;;  %4402 = vmatmul.mubr.msk.f32.vlgmr.msra.gmra.mrb[128].mxu0 %vm1673_vm1, %v5940_v4 }
 0x233   : > { %4990 = vmatpush3.bf16.xpose.msk.msra.mxu1 %vm5931_vm2, %v5985_v35  ;;  %v2390_v18 = vadd.f32 %v4801_v36, %v5848_v26  ;;  %v2384_v37 = vpop.f32.mrb[53].mxu1  ;;  %4469 = vmatprep.mubr.msk.f32.mxu0 %vm1673_vm1, %v5940_v4 }
 0x234   : > { %v4991_v38 = vpack.c.bf16 %v2814_v33, %v2813_v34  ;;  %v2385_v40 = vadd.f32 %v5848_v26, %v2384_v37 }
 0x235   : > { %v2816_v25 = vmax.f32 %v2390_v18, 0.0 }
 0x236   : > { %4993 = vmatprep.subr.msk.bf16.mxu1 %vm5931_vm2, %v4991_v38  ;;  %v2815_v41 = vmax.f32 %v2385_v40, 0.0  ;;  %v4804_v43 = vpop.f32.mrb[54].mxu1 }
 0x237   : > { %v2400_v44 = vadd.f32 %v4804_v43, %v5848_v26  ;;  %v2394_v45 = vpop.f32.mrb[55].mxu1 }
 0x238   : > { %v4997_v46 = vpack.c.bf16 %v2816_v25, %v2815_v41  ;;  %v2395_v35 = vadd.f32 %v5848_v26, %v2394_v45 }
 0x239   : > { %v2818_v47 = vmax.f32 %v2400_v44, 0.0 }
 0x23a   : > { %v2817_v49 = vmax.f32 %v2395_v35, 0.0  ;;  %v4807_v50 = vpop.f32.mrb[56].mxu1 }
 0x23b   : > { %4996 = vmatpush3.bf16.xpose.msk.msra.mxu1 %vm5931_vm2, %v5992_v42  ;;  %v2410_v51 = vadd.f32 %v4807_v50, %v5848_v26  ;;  %v2404_v52 = vpop.f32.mrb[57].mxu1 }
 0x23c   : > { %4999 = vmatprep.subr.msk.bf16.mxu1 %vm5931_vm2, %v4997_v46  ;;  %v5003_v39 = vpack.c.bf16 %v2818_v47, %v2817_v49  ;;  %v2405_v54 = vadd.f32 %v5848_v26, %v2404_v52 }
 0x23d   : > { %v2820_v55 = vmax.f32 %v2410_v51, 0.0 }
 0x23e   : > { %v2819_v57 = vmax.f32 %v2405_v54, 0.0  ;;  %v4810_v58 = vpop.f32.mrb[58].mxu1 }
 0x23f   : > { %v2420_v59 = vadd.f32 %v4810_v58, %v5848_v26  ;;  %v2414_v60 = vpop.f32.mrb[59].mxu1 }
 0x240   : > { %v5009_v63 = vpack.c.bf16 %v2820_v55, %v2819_v57  ;;  %v2415_v0 = vadd.f32 %v5848_v26, %v2414_v60 }
 0x241   : > { %v2822_v2 = vmax.f32 %v2420_v59, 0.0 }
 0x242   : > { %v2821_v42 = vmax.f32 %v2415_v0, 0.0  ;;  %v4813_v3 = vpop.f32.mrb[60].mxu1 }
 0x243   : > { %5002 = vmatpush3.bf16.xpose.msk.msra.mxu1 %vm5931_vm2, %v5998_v48  ;;  %v2430_v5 = vadd.f32 %v4813_v3, %v5848_v26  ;;  %v2424_v53 = vpop.f32.mrb[61].mxu1 }
 0x244   : > { %5005 = vmatprep.subr.msk.bf16.mxu1 %vm5931_vm2, %v5003_v39  ;;  %v5015_v6 = vpack.c.bf16 %v2822_v2, %v2821_v42  ;;  %v2425_v7 = vadd.f32 %v5848_v26, %v2424_v53 }
 0x245   : > { %v2824_v62 = vmax.f32 %v2430_v5, 0.0 }
 0x246   : > { %v2823_v9 = vmax.f32 %v2425_v7, 0.0  ;;  %v4816_v10 = vpop.f32.mrb[62].mxu1 }
 0x247   : > { %v2440_v11 = vadd.f32 %v4816_v10, %v5848_v26  ;;  %v2434_v13 = vpop.f32.mrb[63].mxu1 }
 0x248   : > { %v5021_v14 = vpack.c.bf16 %v2824_v62, %v2823_v9  ;;  %v2435_v16 = vadd.f32 %v5848_v26, %v2434_v13 }
 0x249   : > { %v2826_v17 = vmax.f32 %v2440_v11, 0.0 }
 0x24a   : > { %v2825_v48 = vmax.f32 %v2435_v16, 0.0  ;;  %v4819_v19 = vpop.f32.mrb[64].mxu1 }
 0x24b   : > { %5008 = vmatpush3.bf16.xpose.msk.msra.mxu1 %vm5931_vm2, %v6005_v56  ;;  %v2450_v61 = vadd.f32 %v4819_v19, %v5848_v26  ;;  %v2444_v20 = vpop.f32.mrb[65].mxu1 }
 0x24c   : > { %5011 = vmatprep.subr.msk.bf16.mxu1 %vm5931_vm2, %v5009_v63  ;;  %v5027_v21 = vpack.c.bf16 %v2826_v17, %v2825_v48  ;;  %v2445_v23 = vadd.f32 %v5848_v26, %v2444_v20 }
 0x24d   : > { %v2828_v12 = vmax.f32 %v2450_v61, 0.0 }
 0x24e   : > { %v2827_v24 = vmax.f32 %v2445_v23, 0.0  ;;  %v4822_v27 = vpop.f32.mrb[66].mxu1 }
 0x24f   : > { %v2460_v28 = vadd.f32 %v4822_v27, %v5848_v26  ;;  %v2454_v29 = vpop.f32.mrb[67].mxu1 }
 0x250   : > { %v6077_v30 = vpack.c.bf16 %v2828_v12, %v2827_v24  ;;  %v2455_v31 = vadd.f32 %v5848_v26, %v2454_v29 }
 0x251   : > { %v2830_v56 = vmax.f32 %v2460_v28, 0.0 }
 0x252   : > { %v2829_v33 = vmax.f32 %v2455_v31, 0.0  ;;  %v4825_v34 = vpop.f32.mrb[68].mxu1 }
 0x253   : > { %5014 = vmatpush3.bf16.xpose.msk.msra.mxu1 %vm5931_vm2, %v6011_v1  ;;  %v2470_v36 = vadd.f32 %v4825_v34, %v5848_v26  ;;  %v2464_v18 = vpop.f32.mrb[69].mxu1 }
 0x254   : > { %5017 = vmatprep.subr.msk.bf16.mxu1 %vm5931_vm2, %v5015_v6  ;;  %v6086_v37 = vpack.c.bf16 %v2830_v56, %v2829_v33  ;;  %v2465_v38 = vadd.f32 %v5848_v26, %v2464_v18 }
 0x255   : > { %v2832_v40 = vmax.f32 %v2470_v36, 0.0 }
 0x256   : > { %v2831_v25 = vmax.f32 %v2465_v38, 0.0  ;;  %v4828_v41 = vpop.f32.mrb[70].mxu1 }
 0x257   : > { %v2480_v43 = vadd.f32 %v4828_v41, %v5848_v26  ;;  %v2474_v44 = vpop.f32.mrb[71].mxu1 }
 0x258   : > { %v6090_v45 = vpack.c.bf16 %v2832_v40, %v2831_v25  ;;  %v2475_v1 = vadd.f32 %v5848_v26, %v2474_v44 }
 0x259   : > { %v2834_v46 = vmax.f32 %v2480_v43, 0.0 }
 0x25a   : > { %v2833_v35 = vmax.f32 %v2475_v1, 0.0  ;;  %v4831_v47 = vpop.f32.mrb[72].mxu1 }
 0x25b   : > { %5020 = vmatpush3.bf16.xpose.msk.msra.mxu1 %vm5931_vm2, %v6018_v8  ;;  %v2490_v49 = vadd.f32 %v4831_v47, %v5848_v26  ;;  %v2484_v50 = vpop.f32.mrb[73].mxu1 }
 0x25c   : > { %5023 = vmatprep.subr.msk.bf16.mxu1 %vm5931_vm2, %v5021_v14  ;;  %v6099_v51 = vpack.c.bf16 %v2834_v46, %v2833_v35  ;;  %v2485_v52 = vadd.f32 %v5848_v26, %v2484_v50 }
 0x25d   : > { %v2836_v39 = vmax.f32 %v2490_v49, 0.0 }
 0x25e   : > { %v2835_v54 = vmax.f32 %v2485_v52, 0.0  ;;  %v4834_v55 = vpop.f32.mrb[74].mxu1 }
 0x25f   : > { %v2500_v57 = vadd.f32 %v4834_v55, %v5848_v26  ;;  %v2494_v58 = vpop.f32.mrb[75].mxu1 }
 0x260   : > { %v6103_v59 = vpack.c.bf16 %v2836_v39, %v2835_v54  ;;  %v2495_v8 = vadd.f32 %v5848_v26, %v2494_v58 }
 0x261   : > { %v2838_v60 = vmax.f32 %v2500_v57, 0.0 }
 0x262   : > { %v2837_v63 = vmax.f32 %v2495_v8, 0.0  ;;  %v4837_v0 = vpop.f32.mrb[76].mxu1 }
 0x263   : > { %5026 = vmatpush3.bf16.xpose.msk.msra.mxu1 %vm5931_vm2, %v6024_v15  ;;  %v2510_v2 = vadd.f32 %v4837_v0, %v5848_v26  ;;  %v2504_v42 = vpop.f32.mrb[77].mxu1 }
 0x264   : > { %5029 = vmatprep.subr.msk.bf16.mxu1 %vm5931_vm2, %v5027_v21  ;;  %v6112_v3 = vpack.c.bf16 %v2838_v60, %v2837_v63  ;;  %v2505_v5 = vadd.f32 %v5848_v26, %v2504_v42 }
 0x265   : > { %v2840_v53 = vmax.f32 %v2510_v2, 0.0 }
 0x266   : > { %v2839_v6 = vmax.f32 %v2505_v5, 0.0  ;;  %v4840_v7 = vpop.f32.mrb[78].mxu1 }
 0x267   : > { %v2520_v62 = vadd.f32 %v4840_v7, %v5848_v26  ;;  %v2514_v9 = vpop.f32.mrb[79].mxu1 }
 0x268   : > { %v6116_v10 = vpack.c.bf16 %v2840_v53, %v2839_v6  ;;  %v2515_v15 = vadd.f32 %v5848_v26, %v2514_v9 }
 0x269   : > { %v2842_v11 = vmax.f32 %v2520_v62, 0.0 }
 0x26a   : > { %v2841_v13 = vmax.f32 %v2515_v15, 0.0  ;;  %v4843_v14 = vpop.f32.mrb[80].mxu1 }
 0x26b   : > { %5032 = vmatpush3.bf16.xpose.msk.msra.mxu1 %vm5931_vm2, %v6031_v22  ;;  %v2530_v16 = vadd.f32 %v4843_v14, %v5848_v26  ;;  %v2524_v17 = vpop.f32.mrb[81].mxu1 }
 0x26c   : > { %v6123_v48 = vpack.c.bf16 %v2842_v11, %v2841_v13  ;;  %v2525_v19 = vadd.f32 %v5848_v26, %v2524_v17 }
 0x26d   : > { %v2844_v61 = vmax.f32 %v2530_v16, 0.0 }
 0x26e   : > { %v2843_v20 = vmax.f32 %v2525_v19, 0.0  ;;  %v4846_v21 = vpop.f32.mrb[82].mxu1 }
 0x26f   : > { %v2540_v23 = vadd.f32 %v4846_v21, %v5848_v26  ;;  %v2534_v12 = vpop.f32.mrb[83].mxu1 }
 0x270   : > { %v5033_v24 = vpack.c.bf16 %v2844_v61, %v2843_v20  ;;  %v2535_v27 = vadd.f32 %v5848_v26, %v2534_v12 }
 0x271   : > { %v2846_v28 = vmax.f32 %v2540_v23, 0.0 }
 0x272   : > { %5035 = vmatprep.subr.msk.bf16.mxu0 %vm5931_vm2, %v5033_v24  ;;  %v2845_v22 = vmax.f32 %v2535_v27, 0.0  ;;  %v4849_v29 = vpop.f32.mrb[84].mxu1  ;;  %4436 = vmatmul.mubr.msk.f32.vlgmr.msra.gmra.mrb[128].mxu1 %vm1673_vm1, %v5940_v4 }
 0x273   : > { %5038 = vmatpush3.bf16.xpose.msk.msra.mxu0 %vm5931_vm2, %v6077_v30  ;;  %v2550_v31 = vadd.f32 %v4849_v29, %v5848_v26  ;;  %v2544_v56 = vpop.f32.mrb[85].mxu1  ;;  %4503 = vmatprep.mubr.msk.f32.mxu1 %vm1673_vm1, %v5940_v4 }
 0x274   : > { %v5039_v33 = vpack.c.bf16 %v2846_v28, %v2845_v22  ;;  %v2545_v34 = vadd.f32 %v5848_v26, %v2544_v56 }
 0x275   : > { %v2848_v36 = vmax.f32 %v2550_v31, 0.0 }
 0x276   : > { %5041 = vmatprep.subr.msk.bf16.mxu0 %vm5931_vm2, %v5039_v33  ;;  %v2847_v18 = vmax.f32 %v2545_v34, 0.0  ;;  %v4852_v38 = vpop.f32.mrb[86].mxu1 }
 0x277   : > { %v2560_v40 = vadd.f32 %v4852_v38, %v5848_v26  ;;  %v2554_v25 = vpop.f32.mrb[87].mxu1 }
 0x278   : > { %v5045_v41 = vpack.c.bf16 %v2848_v36, %v2847_v18  ;;  %v2555_v30 = vadd.f32 %v5848_v26, %v2554_v25 }
 0x279   : > { %v2850_v43 = vmax.f32 %v2560_v40, 0.0 }
 0x27a   : > { %v2849_v44 = vmax.f32 %v2555_v30, 0.0  ;;  %v4855_v1 = vpop.f32.mrb[88].mxu1 }
 0x27b   : > { %5044 = vmatpush3.bf16.xpose.msk.msra.mxu0 %vm5931_vm2, %v6086_v37  ;;  %v2570_v46 = vadd.f32 %v4855_v1, %v5848_v26  ;;  %v2564_v35 = vpop.f32.mrb[89].mxu1 }
 0x27c   : > { %5047 = vmatprep.subr.msk.bf16.mxu0 %vm5931_vm2, %v5045_v41  ;;  %v5051_v47 = vpack.c.bf16 %v2850_v43, %v2849_v44  ;;  %v2565_v49 = vadd.f32 %v5848_v26, %v2564_v35 }
 0x27d   : > { %v2852_v50 = vmax.f32 %v2570_v46, 0.0 }
 0x27e   : > { %v2851_v52 = vmax.f32 %v2565_v49, 0.0  ;;  %v4858_v39 = vpop.f32.mrb[90].mxu1 }
 0x27f   : > { %v2580_v54 = vadd.f32 %v4858_v39, %v5848_v26  ;;  %v2574_v55 = vpop.f32.mrb[91].mxu1 }
 0x280   : > { %v5057_v57 = vpack.c.bf16 %v2852_v50, %v2851_v52  ;;  %v2575_v58 = vadd.f32 %v5848_v26, %v2574_v55 }
 0x281   : > { %v2854_v8 = vmax.f32 %v2580_v54, 0.0 }
 0x282   : > { %v2853_v37 = vmax.f32 %v2575_v58, 0.0  ;;  %v4861_v60 = vpop.f32.mrb[92].mxu1 }
 0x283   : > { %5050 = vmatpush3.bf16.xpose.msk.msra.mxu0 %vm5931_vm2, %v6090_v45  ;;  %v2590_v63 = vadd.f32 %v4861_v60, %v5848_v26  ;;  %v2584_v0 = vpop.f32.mrb[93].mxu1 }
 0x284   : > { %5053 = vmatprep.subr.msk.bf16.mxu0 %vm5931_vm2, %v5051_v47  ;;  %v5063_v2 = vpack.c.bf16 %v2854_v8, %v2853_v37  ;;  %v2585_v42 = vadd.f32 %v5848_v26, %v2584_v0 }
 0x285   : > { %v2856_v5 = vmax.f32 %v2590_v63, 0.0 }
 0x286   : > { %v2855_v53 = vmax.f32 %v2585_v42, 0.0  ;;  %v4864_v6 = vpop.f32.mrb[94].mxu1 }
 0x287   : > { %v2600_v7 = vadd.f32 %v4864_v6, %v5848_v26  ;;  %v2594_v62 = vpop.f32.mrb[95].mxu1 }
 0x288   : > { %v5069_v9 = vpack.c.bf16 %v2856_v5, %v2855_v53  ;;  %v2595_v15 = vadd.f32 %v5848_v26, %v2594_v62 }
 0x289   : > { %v2858_v11 = vmax.f32 %v2600_v7, 0.0 }
 0x28a   : > { %v2857_v45 = vmax.f32 %v2595_v15, 0.0  ;;  %v4867_v13 = vpop.f32.mrb[96].mxu1 }
 0x28b   : > { %5056 = vmatpush3.bf16.xpose.msk.msra.mxu0 %vm5931_vm2, %v6099_v51  ;;  %v2610_v14 = vadd.f32 %v4867_v13, %v5848_v26  ;;  %v2604_v16 = vpop.f32.mrb[97].mxu1 }
 0x28c   : > { %5059 = vmatprep.subr.msk.bf16.mxu0 %vm5931_vm2, %v5057_v57  ;;  %v5075_v17 = vpack.c.bf16 %v2858_v11, %v2857_v45  ;;  %v2605_v19 = vadd.f32 %v5848_v26, %v2604_v16 }
 0x28d   : > { %v2860_v61 = vmax.f32 %v2610_v14, 0.0 }
 0x28e   : > { %v2859_v20 = vmax.f32 %v2605_v19, 0.0  ;;  %v4870_v21 = vpop.f32.mrb[98].mxu1 }
 0x28f   : > { %v2620_v23 = vadd.f32 %v4870_v21, %v5848_v26  ;;  %v2614_v12 = vpop.f32.mrb[99].mxu1 }
 0x290   : > { %v6169_v24 = vpack.c.bf16 %v2860_v61, %v2859_v20  ;;  %v2615_v27 = vadd.f32 %v5848_v26, %v2614_v12 }
 0x291   : > { %v2862_v51 = vmax.f32 %v2620_v23, 0.0 }
 0x292   : > { %v2861_v28 = vmax.f32 %v2615_v27, 0.0  ;;  %v4873_v22 = vpop.f32.mrb[100].mxu1 }
 0x293   : > { %5062 = vmatpush3.bf16.xpose.msk.msra.mxu0 %vm5931_vm2, %v6103_v59  ;;  %v2630_v29 = vadd.f32 %v4873_v22, %v5848_v26  ;;  %v2624_v31 = vpop.f32.mrb[101].mxu1 }
 0x294   : > { %5065 = vmatprep.subr.msk.bf16.mxu0 %vm5931_vm2, %v5063_v2  ;;  %v6178_v56 = vpack.c.bf16 %v2862_v51, %v2861_v28  ;;  %v2625_v33 = vadd.f32 %v5848_v26, %v2624_v31 }
 0x295   : > { %v2864_v34 = vmax.f32 %v2630_v29, 0.0 }
 0x296   : > { %v2863_v36 = vmax.f32 %v2625_v33, 0.0  ;;  %v4876_v18 = vpop.f32.mrb[102].mxu1 }
 0x297   : > { %v2640_v38 = vadd.f32 %v4876_v18, %v5848_v26  ;;  %v2634_v40 = vpop.f32.mrb[103].mxu1 }
 0x298   : > { %v6182_v25 = vpack.c.bf16 %v2864_v34, %v2863_v36  ;;  %v2635_v59 = vadd.f32 %v5848_v26, %v2634_v40 }
 0x299   : > { %v2866_v41 = vmax.f32 %v2640_v38, 0.0 }
 0x29a   : > { %v2865_v30 = vmax.f32 %v2635_v59, 0.0  ;;  %v4879_v43 = vpop.f32.mrb[104].mxu1 }
 0x29b   : > { %5068 = vmatpush3.bf16.xpose.msk.msra.mxu0 %vm5931_vm2, %v6112_v3  ;;  %v2650_v44 = vadd.f32 %v4879_v43, %v5848_v26  ;;  %v2644_v1 = vpop.f32.mrb[105].mxu1  ;;  %v6200_v3 = vld [vmem:[%s6332_s4] ss:$0 sm:$0xff] }
 0x29c   : > { %v6189_v46 = vpack.c.bf16 %v2866_v41, %v2865_v30  ;;  %5071 = vmatprep.subr.msk.bf16.mxu0 %vm5931_vm2, %v5069_v9  ;;  %v2645_v35 = vadd.f32 %v5848_v26, %v2644_v1 }
 0x29d   : > { %v2868_v47 = vmax.f32 %v2650_v44, 0.0 }
 0x29e   : > { %v2867_v49 = vmax.f32 %v2645_v35, 0.0  ;;  %v4882_v50 = vpop.f32.mrb[106].mxu1 }
 0x29f   : > { %v2660_v52 = vadd.f32 %v4882_v50, %v5848_v26  ;;  %v2654_v39 = vpop.f32.mrb[107].mxu1 }
 0x2a0   : > { %v6195_v54 = vpack.c.bf16 %v2868_v47, %v2867_v49  ;;  %v2655_v55 = vadd.f32 %v6200_v3, %v2654_v39 }
 0x2a1   : > { %v2870_v57 = vmax.f32 %v2660_v52, 0.0 }
 0x2a2   : > { %v2869_v58 = vmax.f32 %v2655_v55, 0.0  ;;  %v4885_v8 = vpop.f32.mrb[108].mxu1 }
 0x2a3   : > { %5074 = vmatpush3.bf16.xpose.msk.msra.mxu0 %vm5931_vm2, %v6116_v10  ;;  %v2670_v37 = vadd.f32 %v6200_v3, %v4885_v8  ;;  %v2664_v26 = vpop.f32.mrb[109].mxu1 }
 0x2a4   : > { %v6207_v60 = vpack.c.bf16 %v2870_v57, %v2869_v58  ;;  %v2665_v63 = vadd.f32 %v6200_v3, %v2664_v26  ;;  %5077 = vmatprep.subr.msk.bf16.mxu0 %vm5931_vm2, %v5075_v17 }
 0x2a5   : > { %v2872_v0 = vmax.f32 %v2670_v37, 0.0 }
 0x2a6   : > { %v2871_v2 = vmax.f32 %v2665_v63, 0.0  ;;  %v4888_v42 = vpop.f32.mrb[110].mxu1 }
 0x2a7   : > { %v2680_v5 = vadd.f32 %v6200_v3, %v4888_v42  ;;  %v2674_v53 = vpop.f32.mrb[111].mxu1 }
 0x2a8   : > { %v6213_v6 = vpack.c.bf16 %v2872_v0, %v2871_v2  ;;  %v2675_v10 = vadd.f32 %v6200_v3, %v2674_v53 }
 0x2a9   : > { %v2874_v7 = vmax.f32 %v2680_v5, 0.0 }
 0x2aa   : > { %v2873_v62 = vmax.f32 %v2675_v10, 0.0  ;;  %v4891_v9 = vpop.f32.mrb[112].mxu1 }
 0x2ab   : > { %v2690_v15 = vadd.f32 %v6200_v3, %v4891_v9  ;;  %v2684_v11 = vpop.f32.mrb[113].mxu1  ;;  %5080 = vmatpush3.bf16.xpose.msk.msra.mxu0 %vm5931_vm2, %v6123_v48 }
 0x2ac   : > { %v6220_v45 = vpack.c.bf16 %v2874_v7, %v2873_v62  ;;  %v2685_v13 = vadd.f32 %v6200_v3, %v2684_v11  ;;  %v5235_v11 = vmov 1966171168  }
 0x2ad   : > { %v2876_v14 = vmax.f32 %v2690_v15, 0.0 }
 0x2ae   : > { %v2875_v16 = vmax.f32 %v2685_v13, 0.0  ;;  %v4894_v17 = vpop.f32.mrb[114].mxu1  ;;  %v3578_v13 = vunpack.c.l.s4 %v5235_v11 }
 0x2af   : > { %v2700_v19 = vadd.f32 %v6200_v3, %v4894_v17  ;;  %v2694_v61 = vpop.f32.mrb[115].mxu1 }
 0x2b0   : > { %v5081_v20 = vpack.c.bf16 %v2876_v14, %v2875_v16  ;;  %v2695_v21 = vadd.f32 %v6200_v3, %v2694_v61  ;;  %v3579_v14 = vunpack.c.0.s8 %v3578_v13 }
 0x2b1   : > { %v2878_v23 = vmax.f32 %v2700_v19, 0.0 }
 0x2b2   : > { %5083 = vmatprep.subr.msk.bf16.mxu1 %vm5931_vm2, %v5081_v20  ;;  %v2877_v12 = vmax.f32 %v2695_v21, 0.0  ;;  %v4897_v27 = vpop.f32.mrb[116].mxu1  ;;  %4470 = vmatmul.mubr.msk.f32.vlgmr.msra.gmra.mrb[130].mxu0 %vm1673_vm1, %v5940_v4 }
 0x2b3   : > { %5086 = vmatpush3.bf16.xpose.msk.msra.mxu1 %vm5931_vm2, %v6169_v24  ;;  %v2710_v48 = vadd.f32 %v6200_v3, %v4897_v27  ;;  %v2704_v51 = vpop.f32.mrb[117].mxu1 }
 0x2b4   : > { %v5087_v28 = vpack.c.bf16 %v2878_v23, %v2877_v12  ;;  %v2705_v22 = vadd.f32 %v6200_v3, %v2704_v51 }
 0x2b5   : > { %v2880_v29 = vmax.f32 %v2710_v48, 0.0 }
 0x2b6   : > { %5089 = vmatprep.subr.msk.bf16.mxu1 %vm5931_vm2, %v5087_v28  ;;  %v2879_v31 = vmax.f32 %v2705_v22, 0.0  ;;  %v4900_v33 = vpop.f32.mrb[118].mxu1 }
 0x2b7   : > { %v2720_v34 = vadd.f32 %v6200_v3, %v4900_v33  ;;  %v2714_v36 = vpop.f32.mrb[119].mxu1 }
 0x2b8   : > { %v5093_v18 = vpack.c.bf16 %v2880_v29, %v2879_v31  ;;  %v2715_v38 = vadd.f32 %v6200_v3, %v2714_v36 }
 0x2b9   : > { %v2882_v40 = vmax.f32 %v2720_v34, 0.0 }
 0x2ba   : > { %v2881_v24 = vmax.f32 %v2715_v38, 0.0  ;;  %v4903_v59 = vpop.f32.mrb[120].mxu1 }
 0x2bb   : > { %5092 = vmatpush3.bf16.xpose.msk.msra.mxu1 %vm5931_vm2, %v6178_v56  ;;  %v2730_v41 = vadd.f32 %v6200_v3, %v4903_v59  ;;  %v2724_v30 = vpop.f32.mrb[121].mxu1 }
 0x2bc   : > { %5095 = vmatprep.subr.msk.bf16.mxu1 %vm5931_vm2, %v5093_v18  ;;  %v5099_v43 = vpack.c.bf16 %v2882_v40, %v2881_v24  ;;  %v2725_v44 = vadd.f32 %v6200_v3, %v2724_v30 }
 0x2bd   : > { %v2884_v1 = vmax.f32 %v2730_v41, 0.0 }
 0x2be   : > { %v2883_v35 = vmax.f32 %v2725_v44, 0.0  ;;  %v4906_v47 = vpop.f32.mrb[122].mxu1 }
 0x2bf   : > { %v2740_v49 = vadd.f32 %v6200_v3, %v4906_v47  ;;  %v2734_v50 = vpop.f32.mrb[123].mxu1 }
 0x2c0   : > { %v5105_v52 = vpack.c.bf16 %v2884_v1, %v2883_v35  ;;  %v2735_v39 = vadd.f32 %v6200_v3, %v2734_v50 }
 0x2c1   : > { %v2886_v55 = vmax.f32 %v2740_v49, 0.0 }
 0x2c2   : > { %v2885_v56 = vmax.f32 %v2735_v39, 0.0  ;;  %v4909_v57 = vpop.f32.mrb[124].mxu1 }
 0x2c3   : > { %5098 = vmatpush3.bf16.xpose.msk.msra.mxu1 %vm5931_vm2, %v6182_v25  ;;  %v2750_v58 = vadd.f32 %v6200_v3, %v4909_v57  ;;  %v2744_v8 = vpop.f32.mrb[125].mxu1 }
 0x2c4   : > { %5101 = vmatprep.subr.msk.bf16.mxu1 %vm5931_vm2, %v5099_v43  ;;  %v5111_v37 = vpack.c.bf16 %v2886_v55, %v2885_v56  ;;  %v2745_v26 = vadd.f32 %v6200_v3, %v2744_v8 }
 0x2c5   : > { %v2888_v63 = vmax.f32 %v2750_v58, 0.0 }
 0x2c6   : > { %v2887_v0 = vmax.f32 %v2745_v26, 0.0  ;;  %v4912_v2 = vpop.f32.mrb[126].mxu1 }
 0x2c7   : > { %v2760_v42 = vadd.f32 %v6200_v3, %v4912_v2  ;;  %v2754_v5 = vpop.f32.mrb[127].mxu1 }
 0x2c8   : > { %v5117_v53 = vpack.c.bf16 %v2888_v63, %v2887_v0  ;;  %v2755_v10 = vadd.f32 %v6200_v3, %v2754_v5 }
 0x2c9   : > { %v2890_v7 = vmax.f32 %v2760_v42, 0.0 }
 0x2ca   : > { %v2889_v25 = vmax.f32 %v2755_v10, 0.0 }
 0x2cb   : > { %5104 = vmatpush3.bf16.xpose.msk.msra.mxu1 %vm5931_vm2, %v6189_v46  ;;  %v2893_v46 = vstv %s2892_s24 }
 0x2cc   : > { %5107 = vmatprep.subr.msk.bf16.mxu1 %vm5931_vm2, %v5105_v52  ;;  %v5123_v62 = vpack.c.bf16 %v2890_v7, %v2889_v25 }
 0x2d3   : > { %5110 = vmatpush3.bf16.xpose.msk.msra.mxu1 %vm5931_vm2, %v6195_v54 }
 0x2d4   : > { %5113 = vmatprep.subr.msk.bf16.mxu1 %vm5931_vm2, %v5111_v37 }
 0x2db   : > { %5116 = vmatpush3.bf16.xpose.msk.msra.mxu1 %vm5931_vm2, %v6207_v60 }
 0x2dc   : > { %5119 = vmatprep.subr.msk.bf16.mxu1 %vm5931_vm2, %v5117_v53 }
 0x2e3   : > { %5122 = vmatpush3.bf16.xpose.msk.msra.mxu1 %vm5931_vm2, %v6213_v6  ;;  %v3580_v6 = vlaneseq }
 0x2e4   : > { %5125 = vmatprep.subr.msk.bf16.mxu1 %vm5931_vm2, %v5123_v62 }
 0x2e5   : > { %v3581_v16 = vshrl.u32 %v3580_v6, 7 }
 0x2e7   : > { %v3582_v19 = vsub.s32 %v3579_v14, %v3581_v16 }
 0x2eb   : > { %5128 = vmatpush3.bf16.xpose.msk.msra.mxu1 %vm5931_vm2, %v6220_v45 }
 0x2f2   : > { %4504 = vmatmul.mubr.msk.f32.vlgmr.msra.gmra.mrb[130].mxu1 %vm1673_vm1, %v5940_v4 }
 0x305   : > { %v3347_v54 = vpop.f32.mrb[128].mxu0 }
 0x306   : > { %v3348_v3 = vadd.f32 %v3347_v54, %v2893_v46  ;;  %v3349_v60 = vpop.f32.mrb[129].mxu0 }
 0x307   : > { %v3350_v9 = vadd.f32 %v3349_v60, %v2893_v46 }
 0x309   : > { %v3573_v15 = vcombine.low %v3348_v3, %v3350_v9 }
 0x30b   : > { %v3583_v20 = vrot.slane %v3573_v15, %v3582_v19 }
 0x345   : > { %v3418_v17 = vpop.f32.mrb[128].mxu1 }
 0x346   : > { %v3419_v32 = vadd.f32 %v3418_v17, %v2893_v46  ;;  %v3420_v45 = vpop.f32.mrb[129].mxu1 }
 0x347   : > { %v3421_v61 = vadd.f32 %v3420_v45, %v2893_v46 }
 0x349   : > { %v3574_v4 = vcombine.low %v3419_v32, %v3421_v61 }
 0x34b   : > { %v3590_v21 = vrot.slane %v3574_v4, %v3582_v19 }
 0x34d   : > { %v3605_v23 = vcombine.low %v3583_v20, %v3590_v21 }
 0x34f   : > { %v3613_v40 = vrot.slane %v3605_v23, %v3582_v19 }
 0x385   : > { %v3489_v12 = vpop.f32.mrb[130].mxu0 }
 0x386   : > { %v3490_v27 = vadd.f32 %v3489_v12, %v2893_v46  ;;  %v3491_v48 = vpop.f32.mrb[131].mxu0 }
 0x387   : > { %v3492_v51 = vadd.f32 %v3491_v48, %v2893_v46 }
 0x389   : > { %v3575_v28 = vcombine.low %v3490_v27, %v3492_v51 }
 0x38b   : > { %v3597_v34 = vrot.slane %v3575_v28, %v3582_v19 }
 0x3c5   : > { %v3560_v22 = vpop.f32.mrb[130].mxu1 }
 0x3c6   : > { %v3561_v29 = vadd.f32 %v3560_v22, %v2893_v46  ;;  %v3562_v31 = vpop.f32.mrb[131].mxu1 }
 0x3c7   : > { %v3563_v33 = vadd.f32 %v3562_v31, %v2893_v46 }
 0x3c9   : > { %v3576_v36 = vcombine.low %v3561_v29, %v3563_v33 }
 0x3cb   : > { %v3604_v18 = vrot.slane %v3576_v36, %v3582_v19 }
 0x3cd   : > { %v3606_v38 = vcombine.low %v3597_v34, %v3604_v18 }
 0x3cf   : > { %v3620_v24 = vrot.slane %v3606_v38, %v3582_v19 }
 0x3d1   : > { %v3621_v59 = vcombine.low %v3613_v40, %v3620_v24 }
 0x3d3   : > { %3623 = vst [vmem:[%s285_s9] sm:$0xff] %v3621_v59 }
 0x3d4   : > { %5184 = shalt.err (!%p5181_p3)
}
 0x3d5   : > { %s5185_s20 = scalar_lea.hbm %s6286_s6, 128  ;;  %s5189_s24 = scalar_lea.hbm %s6335_s7, 256 }
 0x3d6   : > { %p5186_p4 = scmp.ne.s32.totalorder %s6286_s6, %s5185_s20  ;;  %p5190_p9 = scmp.lt.u32.totalorder %s6286_s6, %s6335_s7 }
 0x3d7   : > { %p5191_p10 = scmp.lt.u32.totalorder %s5189_s24, %s5185_s20  ;;  %p5193_p12 = scmp.lt.u32.totalorder %s5185_s20, %s6286_s6 }
 0x3d8   : > { %p5187_p7 = pnand %p5186_p4, %p5315_p5 }
 0x3d9   : > { %p5192_p11 = por %p5191_p10, %p5190_p9 }
 0x3da   : > { %p5188_p8 = pneg %p5187_p7 }
 0x3db   : > { %p5194_p13 = por %p5193_p12, %p5192_p11 }
 0x3dd   : > { %p5195_p0 = pnand %p5194_p13, %p5188_p8 }
 0x3df   : > { %5198 = shalt.err (!%p5195_p0)
}
 0x3e0   : > { %5129 = dma.vmem_to_hbm [thread:$0]  (%p5315_p5), %s6288_s10, 128, %s6286_s6, %s3625_s16  }
 0x3e1 PF: > { %p5135_p1 = scmp.ge.s32.totalorder %s5233_s29, 2  ;;  %s3651_s9 = sand.u32 1, %s5221_s26  }
 0x3e2   : > { %s3652_s14 = scalar_lea.sflag [#allocation4], %s3651_s9 }
 0x3e3   : > { %p5132_p2 = pnand %p5135_p1, %p5319_p6 }
 0x3e5   : > { %5216 = dma.done.wait (!%p5132_p2), %s3652_s14, 128  }
 0x3e6   : > { %5218 = vsyncadd (!%p5132_p2), %s3652_s14, 4294967168  ;;  %p18_p3 = scmp.ge.s32.totalorder %s5303_s8, 4   ;;  %s6340_s26 = smov %s5225_s27 }
 0x3e7   : > { %s6341_s27 = smov %s5229_s28  ;;  %s6342_s28 = smov %s5313_s11 }
 0x3e8   : > { %s6343_s29 = smov %s5303_s8  ;;  %20 = sbr.rel (!%p18_p3) target bundleno = 5 (0x5), region = 83 }
 0x3ef   :  { %3657 = vsyncpa [#allocation4], 1 }
 0x3f0   :  { %3659 = vsyncpa [#allocation4 + $0x1], 1 }

</bundles_post_ra>
